<compile_context>
chip_gen: v7x
topology: tpu7x:2x2x1
jax: 0.10.0
libtpu: 0.0.40
codegen_flags: <defaults>
</compile_context>

<pallas_src>
import jax
import jax.numpy as jnp
from jax.experimental import pallas as pl
from jax.experimental.pallas import tpu as pltpu

KH = KW = 3  # ConvTranspose2d kernel size


def _pick_band_rows(N, H, W, cout, kpad):
    """Largest TH dividing H with (TH*W) % 128 == 0 (lane-dense stores), keeping
    >= 2 total grid steps (v7x: 2 TensorCores) and per-step VMEM within budget."""
    candidates = [t for t in range(H, 0, -1) if H % t == 0 and (t * W) % 128 == 0]
    if not candidates:
        return H  # fallback: correct but masked stores (perf hazard for odd W)
    budget = 24 << 20  # conservative vs v7x's 32 MiB scoped-VMEM default
    for t in candidates:
        steps = N * (H // t)
        vmem = 2 * (kpad * t * W * 2 + cout * t * W * 4)  # double-buffered in + out
        if steps >= 2 and vmem <= budget:
            return t
    return candidates[-1]


def _band_kernel(xcol_ref, w_ref, b_ref, o_ref):
    """One row band: out^T (Cout, TP) = w (Cout, KPAD) @ im2col (KPAD, TP), bias, sigmoid."""
    acc = jnp.dot(w_ref[...], xcol_ref[...], preferred_element_type=jnp.float32)
    acc = acc + b_ref[...]                                  # (Cout, 1) broadcast over lanes
    # sigmoid(x) = 1 / (1 + exp(-x)); exp on EUP, approx vrcp also EUP (near-free slot).
    o_ref[...] = pl.reciprocal(1.0 + jnp.exp(-acc), approx=True).astype(o_ref.dtype)


def conv_transpose_sigmoid(x_nchw, w_t, b):
    """x_nchw: (N, Cin, H, W); w_t: (Cin, Cout, 3, 3) ConvTranspose2d layout; b: (Cout,)."""
    N, Cin, H, W = x_nchw.shape
    Cout = w_t.shape[1]
    K = KH * KW * Cin
    KPAD = max(32, ((K + 7) // 8) * 8)            # sublane-aligned K; zero rows are free on MXU
    assert K <= KPAD

    TH = _pick_band_rows(N, H, W, Cout, KPAD)
    NBH = H // TH
    TP = TH * W                                   # lane dim of each block

    # --- wrapper glue: zero-pad H and W (handles all borders), im2col -> (N, KPAD, H*W) bf16 ---
    xb = x_nchw.astype(jnp.bfloat16)
    x_pad = jnp.pad(xb, ((0, 0), (0, 0), (1, 1), (1, 1)))              # (N, Cin, H+2, W+2)
    taps = [x_pad[:, :, kh:kh + H, kw:kw + W]
            for kh in range(KH) for kw in range(KW)]                   # each (N, Cin, H, W)
    xcol = jnp.stack(taps, axis=1).reshape(N, K, H * W)                # (N, 27, H*W)
    xcol = jnp.pad(xcol, ((0, 0), (0, KPAD - K), (0, 0)))              # (N, KPAD, H*W)

    # ConvTranspose2d(stride=1, pad=1) == "same" Conv2d with flipped kernel, channels swapped.
    w_eq = jnp.transpose(w_t[:, :, ::-1, ::-1], (2, 3, 0, 1))          # (KH, KW, Cin, Cout)
    w2 = w_eq.reshape(K, Cout).T                                       # (Cout, 27); K order == xcol
    w2 = jnp.pad(w2, ((0, 0), (0, KPAD - K))).astype(jnp.bfloat16)     # (Cout, KPAD)
    b2 = b.reshape(Cout, 1).astype(jnp.float32)

    out_flat = pl.pallas_call(
        _band_kernel,
        out_shape=jax.ShapeDtypeStruct((N, Cout, H * W), jnp.float32),  # flattened NCHW
        grid=(N, NBH),
        in_specs=[
            pl.BlockSpec((None, KPAD, TP), lambda n, i: (n, 0, i)),
            pl.BlockSpec((Cout, KPAD), lambda n, i: (0, 0)),            # resident fused weight
            pl.BlockSpec((Cout, 1), lambda n, i: (0, 0)),               # resident bias
        ],
        out_specs=pl.BlockSpec((None, Cout, TP), lambda n, i: (n, 0, i)),
        compiler_params=pltpu.CompilerParams(
            dimension_semantics=("parallel", "parallel"),
        ),
        cost_estimate=pl.CostEstimate(
            flops=2 * N * H * W * Cout * KPAD,
            transcendentals=N * H * W * Cout,
            bytes_accessed=(N * KPAD * H * W * 2
                            + Cout * KPAD * 2 + Cout * 4
                            + N * Cout * H * W * 4),
        ),
    )(xcol, w2, b2)

    return out_flat.reshape(N, Cout, H, W)


def reference_conv_transpose_sigmoid(x_nchw, w_t, b):
    """Independent f32 reference: direct ConvTranspose2d scatter semantics."""
    N, Cin, H, W = x_nchw.shape
    Cout = w_t.shape[1]
    Hf, Wf = H + KH - 1, W + KW - 1
    y = jnp.zeros((N, Cout, Hf, Wf), jnp.float32)
    for kh in range(KH):
        for kw in range(KW):
            contrib = jnp.einsum("nchw,co->nohw", x_nchw, w_t[:, :, kh, kw])
            y = y.at[:, :, kh:kh + H, kw:kw + W].add(contrib)
    y = y[:, :, 1:1 + H, 1:1 + W] + b[None, :, None, None]              # padding=1 crop
    return jax.nn.sigmoid(y)


if __name__ == "__main__":
    key = jax.random.PRNGKey(0)
    k_x, k_w, k_b = jax.random.split(key, 3)

    N, Cin, Cout, H, W = 1, 3, 32, 64, 64   # matches the PyTorch spec input (1, 3, 64, 64)
    x = jax.random.normal(k_x, (N, Cin, H, W), dtype=jnp.float32)
    # ConvTranspose2d weight layout: (Cin, Cout, KH, KW).
    w_t = jax.random.normal(k_w, (Cin, Cout, KH, KW), dtype=jnp.float32) * 0.1
    b = jax.random.normal(k_b, (Cout,), dtype=jnp.float32) * 0.1

    fn = jax.jit(conv_transpose_sigmoid)
    out = jax.block_until_ready(fn(x, w_t, b))
    ref = jax.block_until_ready(reference_conv_transpose_sigmoid(x, w_t, b))

    assert out.shape == (N, Cout, H, W), out.shape
    max_err = float(jnp.max(jnp.abs(out - ref)))
    # bf16 activations/weights (f32 accum) + approx-reciprocal sigmoid vs f32 reference.
    assert max_err < 2e-2, max_err
    print("KERNEL_OK")
</pallas_src>

<mosaic_0001>
module attributes {stable_mosaic.version = 11 : i64} {
  func.func @_band_kernel(%arg0: i32, %arg1: i32, %arg2: memref<1x32x2048xbf16, #tpu.memory_space<vmem>>, %arg3: memref<32x32xbf16, #tpu.memory_space<vmem>>, %arg4: memref<32x1xf32, #tpu.memory_space<vmem>>, %arg5: memref<1x32x2048xf32, #tpu.memory_space<vmem>>) attributes {dimension_semantics = [#tpu.dimension_semantics<parallel>, #tpu.dimension_semantics<parallel>], iteration_bounds = array<i64: 1, 2>, scalar_prefetch = 0 : i64, scratch_operands = 0 : i64, tpu.core_type = #tpu.core_type<tc>, window_params = [{transform_indices = @transform_0, window_bounds = array<i64: 1, 32, 2048>}, {pipeline_mode = #tpu.pipeline_mode<synchronous>, transform_indices = @transform_1, window_bounds = array<i64: 32, 32>}, {pipeline_mode = #tpu.pipeline_mode<synchronous>, transform_indices = @transform_2, window_bounds = array<i64: 32, 1>}, {transform_indices = @transform_3, window_bounds = array<i64: 1, 32, 2048>}]} {
    %c0 = arith.constant 0 : index
    %c0_0 = arith.constant 0 : index
    %0 = vector.load %arg3[%c0, %c0_0] : memref<32x32xbf16, #tpu.memory_space<vmem>>, vector<32x32xbf16>
    %c0_1 = arith.constant 0 : index
    %c0_2 = arith.constant 0 : index
    %c0_3 = arith.constant 0 : index
    %1 = vector.load %arg2[%c0_1, %c0_2, %c0_3] : memref<1x32x2048xbf16, #tpu.memory_space<vmem>>, vector<1x32x2048xbf16>
    %2 = vector.shape_cast %1 : vector<1x32x2048xbf16> to vector<32x2048xbf16>
    %cst = arith.constant dense<0.000000e+00> : vector<32x2048xf32>
    %3 = tpu.matmul %0, %2, %cst {dimension_numbers = #tpu.dot_dimension_numbers<[1], [0], [0], [1], [0, 0, 1, 1], [], []>} : vector<32x32xbf16>, vector<32x2048xbf16>, vector<32x2048xf32> -> vector<32x2048xf32>
    %c0_4 = arith.constant 0 : index
    %c0_5 = arith.constant 0 : index
    %4 = vector.load %arg4[%c0_4, %c0_5] : memref<32x1xf32, #tpu.memory_space<vmem>>, vector<32x1xf32>
    %5 = vector.broadcast %4 : vector<32x1xf32> to vector<32x2048xf32>
    %6 = arith.addf %3, %5 : vector<32x2048xf32>
    %cst_6 = arith.constant 0.000000e+00 : f32
    %7 = vector.broadcast %cst_6 : f32 to vector<32x2048xf32>
    %8 = arith.subf %7, %6 : vector<32x2048xf32>
    %9 = math.exp %8 : vector<32x2048xf32>
    %cst_7 = arith.constant 1.000000e+00 : f32
    %10 = vector.broadcast %cst_7 : f32 to vector<32x2048xf32>
    %11 = arith.addf %10, %9 : vector<32x2048xf32>
    %12 = tpu.reciprocal %11 {approx = true} : vector<32x2048xf32> -> vector<32x2048xf32>
    %c0_8 = arith.constant 0 : index
    %c0_9 = arith.constant 0 : index
    %c0_10 = arith.constant 0 : index
    %13 = vector.load %arg5[%c0_8, %c0_9, %c0_10] : memref<1x32x2048xf32, #tpu.memory_space<vmem>>, vector<1x32x2048xf32>
    %14 = vector.shape_cast %13 : vector<1x32x2048xf32> to vector<32x2048xf32>
    %15 = vector.shape_cast %12 : vector<32x2048xf32> to vector<1x32x2048xf32>
    tpu.vector_store %arg5[%c0_8, %c0_9, %c0_10], %15 {strides = array<i32>} : memref<1x32x2048xf32, #tpu.memory_space<vmem>>, vector<1x32x2048xf32>,
    return
  }
  func.func @transform_0(%arg0: i32, %arg1: i32) -> (i32, i32, i32) {
    %c0_i32 = arith.constant 0 : i32
    %c0_i32_0 = arith.constant 0 : i32
    return %arg0, %c0_i32, %arg1 : i32, i32, i32
  }
  func.func @transform_1(%arg0: i32, %arg1: i32) -> (i32, i32) {
    %c0_i32 = arith.constant 0 : i32
    %c0_i32_0 = arith.constant 0 : i32
    %c0_i32_1 = arith.constant 0 : i32
    return %c0_i32, %c0_i32_0 : i32, i32
  }
  func.func @transform_2(%arg0: i32, %arg1: i32) -> (i32, i32) {
    %c0_i32 = arith.constant 0 : i32
    %c0_i32_0 = arith.constant 0 : i32
    %c0_i32_1 = arith.constant 0 : i32
    return %c0_i32, %c0_i32_0 : i32, i32
  }
  func.func @transform_3(%arg0: i32, %arg1: i32) -> (i32, i32, i32) {
    %c0_i32 = arith.constant 0 : i32
    %c0_i32_0 = arith.constant 0 : i32
    return %arg0, %c0_i32, %arg1 : i32, i32, i32
  }
}

</mosaic_0001>

<bundles_post_ra>
// kernel: conv_transpose_sigmoid.1
= control target key start
LH: loop header
LB: loop body
LE: loop exit
PB: predicated region body
PF: predicated region fallthrough
CT: control target
= control target key end

     0   :  { %s1968_s12 = smov 0   ;;  %s1970_s13 = smov 0   ;;  %s2633_s0 = inlined_call_operand.vmem [shape: bf16[1,32,4096], index: 0, kind: input, shape index: {}]   ;;  %s2634_s1 = inlined_call_operand.vmem [shape: bf16[32,32], index: 1, kind: input, shape index: {}]   ;;  %s2635_s2 = inlined_call_operand.vmem [shape: f32[32,1], index: 2, kind: input, shape index: {}]   ;;  %s2636_s3 = inlined_call_operand.vmem [shape: f32[1,32,4096], index: 3, kind: output, shape index: {}]  }
   0x1   :  { %s1972_s14 = smov 0   ;;  %s1974_s15 = smov 0  }
   0x2   :  { %s1976_s16 = smov 0  }
   0x3 LB: > { %s22_s17 = sadd.s32 1, %s1941_s15  ;;  %s1539_s18 = sadd.s32 4294967295, %s1945_s16   ;;  %s1945_s16 = sphi %s1976_s16, %s13_s16   ;;  %s1941_s15 = sphi %s1974_s15, %s2641_s15   ;;  %s1937_s14 = sphi %s1972_s14, %s2640_s14   ;;  %s1933_s13 = sphi %s1970_s13, %s2639_s13   ;;  %s1929_s12 = sphi %s1968_s12, %s2638_s12  }
   0x4   : > { %p23_p0 = scmp.ge.s32.totalorder %s22_s17, 2  ;;  %p41_p1 = scmp.ne.s32.totalorder %s1933_s13, %s1929_s12 }
   0x5   : > { %p42_p2 = scmp.eq.s32.totalorder %s1945_s16, 0  ;;  %p115_p4 = scmp.eq.s32.totalorder %s1539_s18, 1 }
   0x6   : > { %s2643_s17 = smov (%p23_p0, %s22_s17), 0  ;;  %s34_s20 = sadd.s32 1, %s1933_s13 }
   0x7   : > { %p43_p3 = por %p42_p2, %p41_p1  ;;  %s30_s19 = ssub.s32 %s1941_s15, %s2643_s17 }
   0x8   : > { %p32_p5 = scmp.eq.s32.totalorder %s30_s19, 0  ;;  %p2003_p6 = por %p115_p4, %p41_p1 }
   0x9   : > { %p1542_p7 = scmp.ge.s32.totalorder %s1945_s16, 2 }
   0xa   : > { %s2008_s22 = scalar_select %p32_p5, %s1933_s13, %s34_s20  }
   0xb   : > { %143 = sbr.rel (%p1542_p7) target bundleno = 38 (0x26), region = 24 }
  0x12   : > { %146 = sbr.rel (!%p43_p3) target bundleno = 38 (0x26), region = 28  ;;  %s148_s23 = sand.u32 (%p43_p3), 1, %s1933_s13  }
  0x13   : > { %s1604_s24 = sshll.u32 (%p43_p3), %s1941_s15, 6  ;;  %s1543_s25 = sshll.u32 (%p43_p3), %s148_s23, 8 }
  0x14   : > { %s2016_s28 = scalar_lea.vmem (%p43_p3), %s2633_s0, %s1604_s24  ;;  %s2021_s29 = scalar_lea.vmem (%p43_p3), [#allocation2], %s1543_s25 }
  0x15   : > { %v168_v0 = vld [vmem:[%s2016_s28] sm:$0xff] (%p43_p3)  ;;  %v170_v1 = vld [vmem:[%s2016_s28 + $0x8] sm:$0xff] (%p43_p3)  ;;  %v172_v2 = vld [vmem:[%s2016_s28 + $0x10] sm:$0xff] (%p43_p3) }
  0x16   : > { %169 = vst [vmem:[%s2021_s29] sm:$0xff] (%p43_p3), %v168_v0  ;;  %171 = vst [vmem:[%s2021_s29 + $0x8] sm:$0xff] (%p43_p3), %v170_v1  ;;  %v174_v3 = vld [vmem:[%s2016_s28 + $0x18] sm:$0xff] (%p43_p3)  ;;  %v176_v4 = vld [vmem:[%s2016_s28 + $0x20] sm:$0xff] (%p43_p3) }
  0x17   : > { %173 = vst [vmem:[%s2021_s29 + $0x10] sm:$0xff] (%p43_p3), %v172_v2  ;;  %v178_v5 = vld [vmem:[%s2016_s28 + $0x28] sm:$0xff] (%p43_p3)  ;;  %175 = vst [vmem:[%s2021_s29 + $0x18] sm:$0xff] (%p43_p3), %v174_v3  ;;  %v180_v6 = vld [vmem:[%s2016_s28 + $0x30] sm:$0xff] (%p43_p3) }
  0x18   : > { %177 = vst [vmem:[%s2021_s29 + $0x20] sm:$0xff] (%p43_p3), %v176_v4  ;;  %179 = vst [vmem:[%s2021_s29 + $0x28] sm:$0xff] (%p43_p3), %v178_v5  ;;  %v182_v7 = vld [vmem:[%s2016_s28 + $0x38] sm:$0xff] (%p43_p3)  ;;  %v184_v8 = vld [vmem:[%s2016_s28 + $0x80] sm:$0xff] (%p43_p3) }
  0x19   : > { %181 = vst [vmem:[%s2021_s29 + $0x30] sm:$0xff] %v180_v6  ;;  %183 = vst [vmem:[%s2021_s29 + $0x38] sm:$0xff] %v182_v7  ;;  %v186_v9 = vld [vmem:[%s2016_s28 + $0x88] sm:$0xff]  ;;  %v188_v10 = vld [vmem:[%s2016_s28 + $0x90] sm:$0xff] }
  0x1a   : > { %185 = vst [vmem:[%s2021_s29 + $0x40] sm:$0xff] %v184_v8  ;;  %v190_v11 = vld [vmem:[%s2016_s28 + $0x98] sm:$0xff]  ;;  %187 = vst [vmem:[%s2021_s29 + $0x48] sm:$0xff] %v186_v9  ;;  %v192_v12 = vld [vmem:[%s2016_s28 + $0xa0] sm:$0xff] }
  0x1b   : > { %189 = vst [vmem:[%s2021_s29 + $0x50] sm:$0xff] %v188_v10  ;;  %191 = vst [vmem:[%s2021_s29 + $0x58] sm:$0xff] %v190_v11  ;;  %v194_v13 = vld [vmem:[%s2016_s28 + $0xa8] sm:$0xff]  ;;  %v196_v14 = vld [vmem:[%s2016_s28 + $0xb0] sm:$0xff] }
  0x1c   : > { %193 = vst [vmem:[%s2021_s29 + $0x60] sm:$0xff] %v192_v12  ;;  %195 = vst [vmem:[%s2021_s29 + $0x68] sm:$0xff] %v194_v13  ;;  %v198_v15 = vld [vmem:[%s2016_s28 + $0xb8] sm:$0xff]  ;;  %v200_v16 = vld [vmem:[%s2016_s28 + $0x100] sm:$0xff] }
  0x1d   : > { %197 = vst [vmem:[%s2021_s29 + $0x70] sm:$0xff] %v196_v14  ;;  %v202_v17 = vld [vmem:[%s2016_s28 + $0x108] sm:$0xff]  ;;  %199 = vst [vmem:[%s2021_s29 + $0x78] sm:$0xff] %v198_v15  ;;  %v204_v18 = vld [vmem:[%s2016_s28 + $0x110] sm:$0xff] }
  0x1e   : > { %201 = vst [vmem:[%s2021_s29 + $0x80] sm:$0xff] %v200_v16  ;;  %203 = vst [vmem:[%s2021_s29 + $0x88] sm:$0xff] %v202_v17  ;;  %v206_v19 = vld [vmem:[%s2016_s28 + $0x118] sm:$0xff]  ;;  %v208_v20 = vld [vmem:[%s2016_s28 + $0x120] sm:$0xff] }
  0x1f   : > { %205 = vst [vmem:[%s2021_s29 + $0x90] sm:$0xff] %v204_v18  ;;  %207 = vst [vmem:[%s2021_s29 + $0x98] sm:$0xff] %v206_v19  ;;  %v210_v21 = vld [vmem:[%s2016_s28 + $0x128] sm:$0xff]  ;;  %v212_v22 = vld [vmem:[%s2016_s28 + $0x130] sm:$0xff] }
  0x20   : > { %209 = vst [vmem:[%s2021_s29 + $0xa0] sm:$0xff] %v208_v20  ;;  %v214_v23 = vld [vmem:[%s2016_s28 + $0x138] sm:$0xff]  ;;  %211 = vst [vmem:[%s2021_s29 + $0xa8] sm:$0xff] %v210_v21  ;;  %v216_v24 = vld [vmem:[%s2016_s28 + $0x180] sm:$0xff] }
  0x21   : > { %213 = vst [vmem:[%s2021_s29 + $0xb0] sm:$0xff] %v212_v22  ;;  %215 = vst [vmem:[%s2021_s29 + $0xb8] sm:$0xff] %v214_v23  ;;  %v218_v25 = vld [vmem:[%s2016_s28 + $0x188] sm:$0xff]  ;;  %v220_v26 = vld [vmem:[%s2016_s28 + $0x190] sm:$0xff] }
  0x22   : > { %217 = vst [vmem:[%s2021_s29 + $0xc0] sm:$0xff] %v216_v24  ;;  %219 = vst [vmem:[%s2021_s29 + $0xc8] sm:$0xff] %v218_v25  ;;  %v222_v27 = vld [vmem:[%s2016_s28 + $0x198] sm:$0xff]  ;;  %v224_v28 = vld [vmem:[%s2016_s28 + $0x1a0] sm:$0xff] }
  0x23   : > { %221 = vst [vmem:[%s2021_s29 + $0xd0] sm:$0xff] %v220_v26  ;;  %v226_v29 = vld [vmem:[%s2016_s28 + $0x1a8] sm:$0xff]  ;;  %223 = vst [vmem:[%s2021_s29 + $0xd8] sm:$0xff] %v222_v27  ;;  %v228_v30 = vld [vmem:[%s2016_s28 + $0x1b0] sm:$0xff] }
  0x24   : > { %225 = vst [vmem:[%s2021_s29 + $0xe0] sm:$0xff] %v224_v28  ;;  %227 = vst [vmem:[%s2021_s29 + $0xe8] sm:$0xff] %v226_v29  ;;  %v230_v31 = vld [vmem:[%s2016_s28 + $0x1b8] sm:$0xff] }
  0x25   : > { %229 = vst [vmem:[%s2021_s29 + $0xf0] sm:$0xff] %v228_v30  ;;  %231 = vst [vmem:[%s2021_s29 + $0xf8] sm:$0xff] %v230_v31 }
  0x26 PF: > { %p1546_p8 = scmp.ge.s32.totalorder %s1945_s16, 1  ;;  %p236_p9 = scmp.lt.s32.totalorder %s1945_s16, 3 }
  0x28   : > { %p237_p10 = pnand %p1546_p8, %p236_p9 }
  0x29   : > { %s243_s30 = sand.u32 (!%p237_p10), 1, %s1929_s12   ;;  %v1947_v32 = vmov (!%p237_p10), 0   ;;  %v304_v33 = vld [vmem:[%s2635_s2] sm:$0xff] (!%p237_p10)  ;;  %vm498_vm0 = vcmask (!%p237_p10), 261120   ;;  %v305_v2 = vld [vmem:[%s2635_s2 + $0x8] sm:$0xff] (!%p237_p10)  ;;  %v306_v7 = vld [vmem:[%s2635_s2 + $0x10] sm:$0xff] (!%p237_p10) }
  0x2a   : > { %240 = sbr.rel (%p237_p10) target bundleno = 424 (0x1a8), region = 51  ;;  %s1547_s4 = sshll.u32 (!%p237_p10), %s243_s30, 8  ;;  %537 = vmatprep.mubr.bf16.mxu0 (!%p237_p10), %v1947_v32  ;;  %590 = vmatprep.mubr.bf16.mxu1 (!%p237_p10), %v1947_v32  ;;  %v2113_v56 = vld [vmem:[%s2634_s1] sm:$0xff] (!%p237_p10)   ;;  %v2138_v11 = vld [vmem:[%s2634_s1 + $0x8] sm:$0xff] (!%p237_p10)   ;;  %v307_v12 = vld [vmem:[%s2635_s2 + $0x18] sm:$0xff] (!%p237_p10) }
  0x2b   : > { %1647 = vset.pattern.permute.xlu0 (!%p237_p10), %v1947_v32  ;;  %1648 = vset.pattern.permute.xlu1 (!%p237_p10), %v1947_v32  ;;  %s2096_s7 = scalar_lea.vmem (!%p237_p10), [#allocation2], %s1547_s4  ;;  %s2222_s26 = sshll.u32 (!%p237_p10), %s243_s30, 9 }
  0x2c   : > { %v272_v34 = vld [vmem:[%s2096_s7] sm:$0xff] (!%p237_p10)  ;;  %v273_v36 = vld [vmem:[%s2096_s7 + $0x8] sm:$0xff] (!%p237_p10)  ;;  %310 = vperm.xlu0 (!%p237_p10), %1647, %v304_v33   ;;  %v274_v47 = vld [vmem:[%s2096_s7 + $0x10] sm:$0xff] (!%p237_p10)  ;;  %320 = vperm.xlu1 (!%p237_p10), %1648, %v306_v7   ;;  %s2243_s12 = scalar_lea.vmem (!%p237_p10), [#allocation3], %s2222_s26 }
  0x2d   : > { %v280_v35 = vld [vmem:[%s2096_s7 + $0x40] sm:$0xff] (!%p237_p10)  ;;  %v281_v38 = vld [vmem:[%s2096_s7 + $0x48] sm:$0xff] (!%p237_p10)  ;;  %v282_v49 = vld [vmem:[%s2096_s7 + $0x50] sm:$0xff] (!%p237_p10) }
  0x2e   : > { %v1552_v37 = vcombine.high (!%p237_p10), %v272_v34, %v280_v35  ;;  %v1551_v39 = vcombine.low (!%p237_p10), %v272_v34, %v280_v35  ;;  %v288_v40 = vld [vmem:[%s2096_s7 + $0x80] sm:$0xff] (!%p237_p10)  ;;  %v1554_v42 = vcombine.high (!%p237_p10), %v273_v36, %v281_v38  ;;  %v1553_v43 = vcombine.low (!%p237_p10), %v273_v36, %v281_v38  ;;  %v289_v45 = vld [vmem:[%s2096_s7 + $0x88] sm:$0xff] (!%p237_p10)  ;;  %v275_v50 = vld [vmem:[%s2096_s7 + $0x18] sm:$0xff] (!%p237_p10) }
  0x2f   : > { %v296_v41 = vld [vmem:[%s2096_s7 + $0xc0] sm:$0xff] (!%p237_p10)  ;;  %v297_v46 = vld [vmem:[%s2096_s7 + $0xc8] sm:$0xff] (!%p237_p10)  ;;  %v283_v51 = vld [vmem:[%s2096_s7 + $0x58] sm:$0xff] (!%p237_p10)  ;;  %v1556_v54 = vcombine.high (!%p237_p10), %v274_v47, %v282_v49  ;;  %v1555_v59 = vcombine.low (!%p237_p10), %v274_v47, %v282_v49 }
  0x30   : > { %v1568_v44 = vcombine.high (!%p237_p10), %v288_v40, %v296_v41  ;;  %505 = vmatprep.subr.bf16.mxu0 (!%p237_p10), %v1552_v37  ;;  %v1570_v48 = vcombine.high (!%p237_p10), %v289_v45, %v297_v46  ;;  %558 = vmatprep.subr.bf16.mxu1 (!%p237_p10), %v1554_v42  ;;  %v1567_v52 = vcombine.low (!%p237_p10), %v288_v40, %v296_v41  ;;  %v290_v57 = vld [vmem:[%s2096_s7 + $0x90] sm:$0xff] (!%p237_p10)  ;;  %v291_v60 = vld [vmem:[%s2096_s7 + $0x98] sm:$0xff] (!%p237_p10)  ;;  %v276_v0 = vld [vmem:[%s2096_s7 + $0x20] sm:$0xff] (!%p237_p10) }
  0x31   : > { %506 = vmatpush1.bf16.msra.mxu0 %v1551_v39  ;;  %559 = vmatpush1.bf16.msra.mxu1 %v1553_v43  ;;  %v1569_v53 = vcombine.low %v289_v45, %v297_v46  ;;  %v1558_v55 = vcombine.high %v275_v50, %v283_v51  ;;  %v298_v58 = vld [vmem:[%s2096_s7 + $0xd0] sm:$0xff]  ;;  %v299_v61 = vld [vmem:[%s2096_s7 + $0xd8] sm:$0xff]  ;;  %v1557_v62 = vcombine.low %v275_v50, %v283_v51  ;;  %v284_v1 = vld [vmem:[%s2096_s7 + $0x60] sm:$0xff]  ;;  %s1605_s27 = sshll.u32 (%p2003_p6), %s1937_s14, 7 }
  0x32   : > { %507 = vmatprep.subr.bf16.mxu0 %v1568_v44  ;;  %560 = vmatprep.subr.bf16.mxu1 %v1570_v48  ;;  %v1572_v63 = vcombine.high %v290_v57, %v298_v58  ;;  %v1574_v3 = vcombine.high %v291_v60, %v299_v61  ;;  %v277_v4 = vld [vmem:[%s2096_s7 + $0x28] sm:$0xff]  ;;  %v1571_v6 = vcombine.low %v290_v57, %v298_v58  ;;  %v292_v13 = vld [vmem:[%s2096_s7 + $0xa0] sm:$0xff]  ;;  %v278_v20 = vld [vmem:[%s2096_s7 + $0x30] sm:$0xff]  ;;  %s2491_s30 = scalar_lea.vmem (%p2003_p6), %s2636_s3, %s1605_s27 }
  0x33   : > { %v285_v5 = vld [vmem:[%s2096_s7 + $0x68] sm:$0xff]  ;;  %315 = vperm.xlu0 %1647, %v305_v2   ;;  %v1573_v8 = vcombine.low %v291_v60, %v299_v61  ;;  %v1560_v9 = vcombine.high %v276_v0, %v284_v1  ;;  %325 = vperm.xlu1 %1648, %v307_v12   ;;  %v300_v14 = vld [vmem:[%s2096_s7 + $0xe0] sm:$0xff]  ;;  %v1559_v15 = vcombine.low %v276_v0, %v284_v1  ;;  %v286_v21 = vld [vmem:[%s2096_s7 + $0x70] sm:$0xff] }
  0x34   : > { %v1562_v10 = vcombine.high %v277_v4, %v285_v5  ;;  %v293_v16 = vld [vmem:[%s2096_s7 + $0xa8] sm:$0xff]  ;;  %v1561_v18 = vcombine.low %v277_v4, %v285_v5  ;;  %v1576_v19 = vcombine.high %v292_v13, %v300_v14  ;;  %v279_v23 = vld [vmem:[%s2096_s7 + $0x38] sm:$0xff]  ;;  %v1575_v25 = vcombine.low %v292_v13, %v300_v14  ;;  %v294_v29 = vld [vmem:[%s2096_s7 + $0xb0] sm:$0xff] }
  0x35   : > { %508 = vmatpush1.bf16.msra.mxu0 %v1567_v52  ;;  %561 = vmatpush1.bf16.msra.mxu1 %v1569_v53  ;;  %v301_v17 = vld [vmem:[%s2096_s7 + $0xe8] sm:$0xff]  ;;  %v287_v24 = vld [vmem:[%s2096_s7 + $0x78] sm:$0xff]  ;;  %v1564_v27 = vcombine.high %v278_v20, %v286_v21  ;;  %v302_v30 = vld [vmem:[%s2096_s7 + $0xf0] sm:$0xff]  ;;  %v1563_v31 = vcombine.low %v278_v20, %v286_v21 }
  0x36   : > { %611 = vmatprep.subr.bf16.mxu0 %v1556_v54  ;;  %664 = vmatprep.subr.bf16.mxu1 %v1558_v55  ;;  %v1578_v22 = vcombine.high %v293_v16, %v301_v17  ;;  %v1577_v26 = vcombine.low %v293_v16, %v301_v17  ;;  %v1566_v28 = vcombine.high %v279_v23, %v287_v24  ;;  %v295_v33 = vld [vmem:[%s2096_s7 + $0xb8] sm:$0xff] }
  0x37   : > { %v303_v34 = vld [vmem:[%s2096_s7 + $0xf8] sm:$0xff]  ;;  %v1565_v35 = vcombine.low %v279_v23, %v287_v24  ;;  %v1580_v36 = vcombine.high %v294_v29, %v302_v30  ;;  %v1579_v38 = vcombine.low %v294_v29, %v302_v30 }
  0x38   : > { %1583 = vmatmul.mubr.msk.bf16.vlgmr.msra.gmra.mrb[0].mxu0 %vm498_vm0, %v2113_v56  ;;  %1585 = vmatmul.mubr.msk.bf16.vlgmr.msra.gmra.mrb[0].mxu1 %vm498_vm0, %v2113_v56  ;;  %v1582_v37 = vcombine.high %v295_v33, %v303_v34  ;;  %v1581_v39 = vcombine.low %v295_v33, %v303_v34 }
  0x39   : > { %612 = vmatpush1.bf16.msra.mxu0 %v1555_v59  ;;  %665 = vmatpush1.bf16.msra.mxu1 %v1557_v62 }
  0x3a   : > { %547 = vmatprep.mubr.bf16.mxu0 %v1947_v32  ;;  %600 = vmatprep.mubr.bf16.mxu1 %v1947_v32 }
  0x3b   : > { %613 = vmatprep.subr.bf16.mxu0 %v1572_v63  ;;  %666 = vmatprep.subr.bf16.mxu1 %v1574_v3 }
  0x3d   : > { %614 = vmatpush1.bf16.msra.mxu0 %v1571_v6  ;;  %667 = vmatpush1.bf16.msra.mxu1 %v1573_v8 }
  0x3e   : > { %717 = vmatprep.subr.bf16.mxu0 %v1560_v9  ;;  %770 = vmatprep.subr.bf16.mxu1 %v1562_v10 }
  0x40   : > { %1584 = vmatmul.mubr.msk.bf16.gmra.mrb[4].mxu0 %vm498_vm0, %v2138_v11  ;;  %1586 = vmatmul.mubr.msk.bf16.gmra.mrb[4].mxu1 %vm498_vm0, %v2138_v11 }
  0x41   : > { %643 = vmatprep.mubr.bf16.mxu0 %v1947_v32  ;;  %696 = vmatprep.mubr.bf16.mxu1 %v1947_v32 }
  0x48   : > { %1587 = vmatmul.mubr.msk.bf16.vlgmr.msra.gmra.mrb[8].mxu0 %vm498_vm0, %v2113_v56  ;;  %1589 = vmatmul.mubr.msk.bf16.vlgmr.msra.gmra.mrb[8].mxu1 %vm498_vm0, %v2113_v56 }
  0x49   : > { %718 = vmatpush1.bf16.msra.mxu0 %v1559_v15  ;;  %771 = vmatpush1.bf16.msra.mxu1 %v1561_v18 }
  0x4a   : > { %653 = vmatprep.mubr.bf16.mxu0 %v1947_v32  ;;  %706 = vmatprep.mubr.bf16.mxu1 %v1947_v32 }
  0x4b   : > { %719 = vmatprep.subr.bf16.mxu0 %v1576_v19  ;;  %772 = vmatprep.subr.bf16.mxu1 %v1578_v22 }
  0x4d   : > { %720 = vmatpush1.bf16.msra.mxu0 %v1575_v25  ;;  %773 = vmatpush1.bf16.msra.mxu1 %v1577_v26 }
  0x4e   : > { %823 = vmatprep.subr.bf16.mxu0 %v1564_v27  ;;  %876 = vmatprep.subr.bf16.mxu1 %v1566_v28 }
  0x50   : > { %1588 = vmatmul.mubr.msk.bf16.gmra.mrb[12].mxu0 %vm498_vm0, %v2138_v11  ;;  %1590 = vmatmul.mubr.msk.bf16.gmra.mrb[12].mxu1 %vm498_vm0, %v2138_v11 }
  0x51   : > { %749 = vmatprep.mubr.bf16.mxu0 %v1947_v32  ;;  %802 = vmatprep.mubr.bf16.mxu1 %v1947_v32 }
  0x58   : > { %1591 = vmatmul.mubr.msk.bf16.vlgmr.msra.gmra.mrb[16].mxu0 %vm498_vm0, %v2113_v56  ;;  %1593 = vmatmul.mubr.msk.bf16.vlgmr.msra.gmra.mrb[16].mxu1 %vm498_vm0, %v2113_v56 }
  0x59   : > { %824 = vmatpush1.bf16.msra.mxu0 %v1563_v31  ;;  %877 = vmatpush1.bf16.msra.mxu1 %v1565_v35 }
  0x5a   : > { %759 = vmatprep.mubr.bf16.mxu0 %v1947_v32  ;;  %812 = vmatprep.mubr.bf16.mxu1 %v1947_v32 }
  0x5b   : > { %825 = vmatprep.subr.bf16.mxu0 %v1580_v36  ;;  %878 = vmatprep.subr.bf16.mxu1 %v1582_v37 }
  0x5d   : > { %826 = vmatpush1.bf16.msra.mxu0 %v1579_v38  ;;  %879 = vmatpush1.bf16.msra.mxu1 %v1581_v39 }
  0x60   : > { %1592 = vmatmul.mubr.msk.bf16.gmra.mrb[20].mxu0 %vm498_vm0, %v2138_v11  ;;  %1594 = vmatmul.mubr.msk.bf16.gmra.mrb[20].mxu1 %vm498_vm0, %v2138_v11 }
  0x61   : > { %855 = vmatprep.mubr.bf16.mxu0 %v1947_v32  ;;  %908 = vmatprep.mubr.bf16.mxu1 %v1947_v32 }
  0x68   : > { %1595 = vmatmul.mubr.msk.bf16.vlgmr.msra.gmra.mrb[24].mxu0 %vm498_vm0, %v2113_v56  ;;  %1597 = vmatmul.mubr.msk.bf16.vlgmr.msra.gmra.mrb[24].mxu1 %vm498_vm0, %v2113_v56 }
  0x69   : > { %865 = vmatprep.mubr.bf16.mxu0 %v1947_v32  ;;  %918 = vmatprep.mubr.bf16.mxu1 %v1947_v32 }
  0x70   : > { %1596 = vmatmul.mubr.msk.bf16.gmra.mrb[28].mxu0 %vm498_vm0, %v2138_v11  ;;  %1598 = vmatmul.mubr.msk.bf16.gmra.mrb[28].mxu1 %vm498_vm0, %v2138_v11 }
  0xab   : > { %v2195_v40 = vpop.permute.xlu0 %310  ;;  %v2199_v43 = vpop.permute.xlu1 %320 }
  0xb2   : > { %v2197_v41 = vpop.permute.xlu0 %315  ;;  %v2209_v9 = vpop.permute.xlu1 %325 }
 0x10b   : > { %v539_v42 = vpop.f32.mrb[0].mxu0  ;;  %v592_v45 = vpop.f32.mrb[0].mxu1 }
 0x10c   : > { %v540_v44 = vadd.f32 %v539_v42, %v2195_v40  ;;  %v541_v46 = vpop.f32.mrb[1].mxu0  ;;  %v593_v47 = vadd.f32 %v592_v45, %v2195_v40  ;;  %v594_v48 = vpop.f32.mrb[1].mxu1 }
 0x10d   : > { %v542_v32 = vadd.f32 %v541_v46, %v2195_v40  ;;  %v543_v49 = vpop.f32.mrb[2].mxu0  ;;  %v595_v51 = vadd.f32 %v594_v48, %v2195_v40  ;;  %v596_v53 = vpop.f32.mrb[2].mxu1 }
 0x10e   : > { %v929_v50 = vsub.f32 0.0, %v540_v44  ;;  %v544_v52 = vadd.f32 %v543_v49, %v2197_v41  ;;  %v545_v54 = vpop.f32.mrb[3].mxu0  ;;  %v931_v55 = vsub.f32 0.0, %v593_v47  ;;  %v597_v57 = vadd.f32 %v596_v53, %v2197_v41  ;;  %v598_v59 = vpop.f32.mrb[3].mxu1 }
 0x10f   : > { %v930_v56 = vsub.f32 0.0, %v542_v32  ;;  %v546_v58 = vadd.f32 %v545_v54, %v2197_v41  ;;  %v932_v61 = vsub.f32 0.0, %v595_v51  ;;  %v599_v63 = vadd.f32 %v598_v59, %v2197_v41 }
 0x110   : > { %v993_v60 = vmul.f32 1.442695, %v929_v50  ;;  %v945_v62 = vsub.f32 0.0, %v544_v52  ;;  %v997_v0 = vmul.f32 1.442695, %v931_v55  ;;  %v947_v2 = vsub.f32 0.0, %v597_v57 }
 0x111   : > { %v995_v1 = vmul.f32 1.442695, %v930_v56  ;;  %v946_v3 = vsub.f32 0.0, %v546_v58  ;;  %v999_v4 = vmul.f32 1.442695, %v932_v61  ;;  %v948_v6 = vsub.f32 0.0, %v599_v63 }
 0x112   : > { %1651 = vpow2.f32 %v993_v60  ;;  %v1025_v5 = vmul.f32 1.442695, %v945_v62  ;;  %v1029_v7 = vmul.f32 1.442695, %v947_v2 }
 0x113   : > { %1653 = vpow2.f32 %v997_v0  ;;  %v549_v8 = vpop.f32.mrb[4].mxu0  ;;  %v1027_v10 = vmul.f32 1.442695, %v946_v3  ;;  %v602_v12 = vpop.f32.mrb[4].mxu1  ;;  %v1031_v14 = vmul.f32 1.442695, %v948_v6 }
 0x114   : > { %1655 = vpow2.f32 %v995_v1  ;;  %v550_v11 = vadd.f32 %v549_v8, %v2199_v43  ;;  %v551_v13 = vpop.f32.mrb[5].mxu0  ;;  %v603_v15 = vadd.f32 %v602_v12, %v2199_v43  ;;  %v604_v17 = vpop.f32.mrb[5].mxu1 }
 0x115   : > { %1657 = vpow2.f32 %v999_v4  ;;  %v552_v16 = vadd.f32 %v551_v13, %v2199_v43  ;;  %v553_v18 = vpop.f32.mrb[6].mxu0  ;;  %v605_v20 = vadd.f32 %v604_v17, %v2199_v43  ;;  %v606_v22 = vpop.f32.mrb[6].mxu1 }
 0x116   : > { %1659 = vpow2.f32 %v1025_v5  ;;  %v961_v19 = vsub.f32 0.0, %v550_v11  ;;  %v554_v21 = vadd.f32 %v553_v18, %v2209_v9  ;;  %v555_v23 = vpop.f32.mrb[7].mxu0  ;;  %v963_v24 = vsub.f32 0.0, %v603_v15  ;;  %v608_v26 = vpop.f32.mrb[7].mxu1 }
 0x117   : > { %1661 = vpow2.f32 %v1029_v7  ;;  %v962_v25 = vsub.f32 0.0, %v552_v16  ;;  %v964_v28 = vsub.f32 0.0, %v605_v20  ;;  %v607_v37 = vadd.f32 %v606_v22, %v2209_v9 }
 0x118   : > { %1663 = vpow2.f32 %v1027_v10  ;;  %v1057_v27 = vmul.f32 1.442695, %v961_v19  ;;  %v977_v29 = vsub.f32 0.0, %v554_v21  ;;  %v1061_v30 = vmul.f32 1.442695, %v963_v24 }
 0x119   : > { %1665 = vpow2.f32 %v1031_v14  ;;  %v1059_v31 = vmul.f32 1.442695, %v962_v25  ;;  %v1063_v33 = vmul.f32 1.442695, %v964_v28  ;;  %v556_v48 = vadd.f32 %v555_v23, %v2209_v9 }
 0x11a   : > { %1667 = vpow2.f32 %v1057_v27  ;;  %v1089_v34 = vmul.f32 1.442695, %v977_v29  ;;  %v979_v56 = vsub.f32 0.0, %v607_v37  ;;  %v609_v59 = vadd.f32 %v608_v26, %v2209_v9 }
 0x11b   : > { %1669 = vpow2.f32 %v1061_v30  ;;  %v645_v35 = vpop.f32.mrb[8].mxu0  ;;  %v698_v38 = vpop.f32.mrb[8].mxu1  ;;  %v978_v62 = vsub.f32 0.0, %v556_v48 }
 0x11c   : > { %v1652_v36 = vpop.eup %1651  ;;  %1671 = vpow2.f32 %v1059_v31  ;;  %v647_v39 = vpop.f32.mrb[9].mxu0  ;;  %v646_v1 = vadd.f32 %v645_v35, %v2195_v40  ;;  %v1093_v5 = vmul.f32 1.442695, %v979_v56  ;;  %v699_v6 = vadd.f32 %v698_v38, %v2195_v40 }
 0x11d   : > { %v1654_v42 = vpop.eup %1653  ;;  %v1121_v44 = vadd.f32 1.0, %v1652_v36  ;;  %1673 = vpow2.f32 %v1063_v33  ;;  %v700_v45 = vpop.f32.mrb[9].mxu1  ;;  %v980_v12 = vsub.f32 0.0, %v609_v59  ;;  %v648_v13 = vadd.f32 %v647_v39, %v2195_v40 }
 0x11e   : > { %v649_v46 = vpop.f32.mrb[10].mxu0  ;;  %v1656_v47 = vpop.eup %1655  ;;  %v1123_v32 = vadd.f32 1.0, %v1654_v42  ;;  %1675 = vpow2.f32 %v1089_v34  ;;  %v1091_v18 = vmul.f32 1.442695, %v978_v62  ;;  %v701_v19 = vadd.f32 %v700_v45, %v2195_v40 }
 0x11f   : > { %v702_v49 = vpop.f32.mrb[10].mxu1  ;;  %v651_v50 = vpop.f32.mrb[11].mxu0  ;;  %1677 = vrcp.f32 %v1121_v44  ;;  %v1122_v52 = vadd.f32 1.0, %v1656_v47  ;;  %v933_v24 = vsub.f32 0.0, %v646_v1  ;;  %v650_v25 = vadd.f32 %v649_v46, %v2197_v41 }
 0x120   : > { %v1658_v51 = vpop.eup %1657  ;;  %v704_v53 = vpop.f32.mrb[11].mxu1  ;;  %1679 = vrcp.f32 %v1123_v32  ;;  %v935_v29 = vsub.f32 0.0, %v699_v6  ;;  %v703_v30 = vadd.f32 %v702_v49, %v2197_v41  ;;  %v934_v34 = vsub.f32 0.0, %v648_v13 }
 0x121   : > { %v1660_v54 = vpop.eup %1659  ;;  %v1124_v55 = vadd.f32 1.0, %v1658_v51  ;;  %1681 = vrcp.f32 %v1122_v52  ;;  %v652_v35 = vadd.f32 %v651_v50, %v2197_v41  ;;  %v1095_v37 = vmul.f32 1.442695, %v980_v12 }
 0x122   : > { %v1662_v57 = vpop.eup %1661  ;;  %v1137_v58 = vadd.f32 1.0, %v1660_v54  ;;  %v936_v38 = vsub.f32 0.0, %v701_v19  ;;  %v705_v39 = vadd.f32 %v704_v53, %v2197_v41  ;;  %v1001_v44 = vmul.f32 1.442695, %v933_v24 }
 0x123   : > { %v1664_v60 = vpop.eup %1663  ;;  %1683 = vrcp.f32 %v1124_v55  ;;  %v1139_v61 = vadd.f32 1.0, %v1662_v57  ;;  %v655_v2 = vpop.f32.mrb[12].mxu0  ;;  %v949_v45 = vsub.f32 0.0, %v650_v25  ;;  %v1005_v48 = vmul.f32 1.442695, %v935_v29 }
 0x124   : > { %v1666_v63 = vpop.eup %1665  ;;  %1685 = vrcp.f32 %v1137_v58  ;;  %v1138_v0 = vadd.f32 1.0, %v1664_v60  ;;  %v708_v7 = vpop.f32.mrb[12].mxu1  ;;  %v656_v46 = vadd.f32 %v655_v2, %v2199_v43  ;;  %v951_v49 = vsub.f32 0.0, %v703_v30 }
 0x125   : > { %v1668_v3 = vpop.eup %1667  ;;  %1687 = vrcp.f32 %v1139_v61  ;;  %v1140_v4 = vadd.f32 1.0, %v1666_v63  ;;  %v2225_v8 = vpop.f32.mrb[13].mxu0  ;;  %v709_v50 = vadd.f32 %v708_v7, %v2199_v43  ;;  %v1003_v54 = vmul.f32 1.442695, %v934_v34 }
 0x126   : > { %v1670_v10 = vpop.eup %1669  ;;  %1689 = vrcp.f32 %v1138_v0  ;;  %v1153_v11 = vadd.f32 1.0, %v1668_v3  ;;  %v2228_v14 = vpop.f32.mrb[13].mxu1  ;;  %v950_v55 = vsub.f32 0.0, %v652_v35  ;;  %v1007_v59 = vmul.f32 1.442695, %v936_v38 }
 0x127   : > { %v2230_v15 = vpop.f32.mrb[14].mxu0  ;;  %v1672_v16 = vpop.eup %1671  ;;  %1691 = vrcp.f32 %v1140_v4  ;;  %v1155_v17 = vadd.f32 1.0, %v1670_v10  ;;  %v952_v60 = vsub.f32 0.0, %v705_v39  ;;  %v1033_v0 = vmul.f32 1.442695, %v949_v45 }
 0x128   : > { %v2233_v20 = vpop.f32.mrb[14].mxu1  ;;  %v2235_v21 = vpop.f32.mrb[15].mxu0  ;;  %1693 = vrcp.f32 %v1153_v11  ;;  %v1154_v23 = vadd.f32 1.0, %v1672_v16  ;;  %v965_v1 = vsub.f32 0.0, %v656_v46  ;;  %v1037_v4 = vmul.f32 1.442695, %v951_v49 }
 0x129   : > { %v1674_v22 = vpop.eup %1673  ;;  %v2238_v26 = vpop.f32.mrb[15].mxu1  ;;  %1695 = vrcp.f32 %v1155_v17  ;;  %v1035_v7 = vmul.f32 1.442695, %v950_v55  ;;  %v1039_v11 = vmul.f32 1.442695, %v952_v60  ;;  %v658_v19 = vadd.f32 %v2225_v8, %v2199_v43 }
 0x12a   : > { %v1676_v27 = vpop.eup %1675  ;;  %v1156_v28 = vadd.f32 1.0, %v1674_v22  ;;  %1697 = vrcp.f32 %v1154_v23  ;;  %v1065_v13 = vmul.f32 1.442695, %v965_v1  ;;  %v711_v25 = vadd.f32 %v2228_v14, %v2199_v43 }
 0x12b   : > { %v1678_v31 = vpop.eup %1677  ;;  %v1169_v33 = vadd.f32 1.0, %v1676_v27  ;;  %v2249_v47 = vpop.f32.mrb[16].mxu0  ;;  %v660_v34 = vadd.f32 %v2230_v15, %v2209_v9  ;;  %v966_v14 = vsub.f32 0.0, %v658_v19 }
 0x12c   : > { %v1680_v36 = vpop.eup %1679  ;;  %1249 = vst [vmem:[%s2243_s12] sm:$0xff] %v1678_v31  ;;  %1699 = vrcp.f32 %v1156_v28  ;;  %v2253_v51 = vpop.f32.mrb[16].mxu1 }
 0x12d   : > { %v1682_v42 = vpop.eup %1681  ;;  %1251 = vst [vmem:[%s2243_s12 + $0x10] sm:$0xff] %v1680_v36  ;;  %1701 = vrcp.f32 %v1169_v33  ;;  %v2255_v52 = vpop.f32.mrb[17].mxu0  ;;  %v981_v49 = vsub.f32 0.0, %v660_v34 }
 0x12e   : > { %v1684_v32 = vpop.eup %1683  ;;  %1250 = vst [vmem:[%s2243_s12 + $0x8] sm:$0xff] %v1682_v42  ;;  %1703 = vpow2.f32 %v1093_v5  ;;  %v2258_v56 = vpop.f32.mrb[17].mxu1  ;;  %v967_v5 = vsub.f32 0.0, %v709_v50  ;;  %v968_v42 = vsub.f32 0.0, %v711_v25  ;;  %v2302_v50 = vadd.f32 %v2235_v21, %v2209_v9 }
 0x12f   : > { %v1686_v53 = vpop.eup %1685  ;;  %1252 = vst [vmem:[%s2243_s12 + $0x18] sm:$0xff] %v1684_v32  ;;  %1705 = vpow2.f32 %v1091_v18  ;;  %v2260_v57 = vpop.f32.mrb[18].mxu0  ;;  %v2298_v32 = vadd.f32 %v2233_v20, %v2209_v9 }
 0x130   : > { %v1688_v58 = vpop.eup %1687  ;;  %1265 = vst [vmem:[%s2243_s12 + $0x80] sm:$0xff] %v1686_v53  ;;  %1707 = vpow2.f32 %v1095_v37  ;;  %v2263_v61 = vpop.f32.mrb[18].mxu1  ;;  %v1069_v18 = vmul.f32 1.442695, %v967_v5  ;;  %v715_v5 = vadd.f32 %v2238_v26, %v2209_v9 }
 0x131   : > { %v2265_v62 = vpop.f32.mrb[19].mxu0  ;;  %v1690_v63 = vpop.eup %1689  ;;  %1267 = vst [vmem:[%s2243_s12 + $0x90] sm:$0xff] %v1688_v58  ;;  %1709 = vpow2.f32 %v1001_v44  ;;  %v1067_v58 = vmul.f32 1.442695, %v966_v14 }
 0x132   : > { %v810_v2 = vpop.f32.mrb[19].mxu1  ;;  %v1692_v3 = vpop.eup %1691  ;;  %1266 = vst [vmem:[%s2243_s12 + $0x88] sm:$0xff] %v1690_v63  ;;  %1711 = vpow2.f32 %v1005_v48 }
 0x133   : > { %v1694_v6 = vpop.eup %1693  ;;  %1268 = vst [vmem:[%s2243_s12 + $0x98] sm:$0xff] %v1692_v3  ;;  %1713 = vpow2.f32 %v1003_v54  ;;  %v2272_v16 = vpop.f32.mrb[20].mxu0  ;;  %v2294_v44 = vadd.f32 %v810_v2, %v2197_v41 }
 0x134   : > { %v1696_v10 = vpop.eup %1695  ;;  %1281 = vst [vmem:[%s2243_s12 + $0x100] sm:$0xff] %v1694_v6  ;;  %1715 = vpow2.f32 %v1007_v59  ;;  %v2277_v22 = vpop.f32.mrb[20].mxu1 }
 0x135   : > { %v1698_v12 = vpop.eup %1697  ;;  %1283 = vst [vmem:[%s2243_s12 + $0x110] sm:$0xff] %v1696_v10  ;;  %1717 = vpow2.f32 %v1033_v0  ;;  %v2279_v23 = vpop.f32.mrb[21].mxu0  ;;  %v1071_v0 = vmul.f32 1.442695, %v968_v42 }
 0x136   : > { %v1700_v17 = vpop.eup %1699  ;;  %1282 = vst [vmem:[%s2243_s12 + $0x108] sm:$0xff] %v1698_v12  ;;  %1719 = vpow2.f32 %v1037_v4  ;;  %v2284_v27 = vpop.f32.mrb[21].mxu1  ;;  %v983_v4 = vsub.f32 0.0, %v2298_v32  ;;  %v1097_v12 = vmul.f32 1.442695, %v981_v49 }
 0x137   : > { %v1702_v24 = vpop.eup %1701  ;;  %1284 = vst [vmem:[%s2243_s12 + $0x118] sm:$0xff] %v1700_v17  ;;  %1721 = vpow2.f32 %v1035_v7  ;;  %v765_v28 = vpop.f32.mrb[22].mxu0 }
 0x138   : > { %v1704_v29 = vpop.eup %1703  ;;  %1297 = vst [vmem:[%s2243_s12 + $0x180] sm:$0xff] %v1702_v24  ;;  %1723 = vpow2.f32 %v1039_v11  ;;  %v818_v30 = vpop.f32.mrb[22].mxu1  ;;  %v752_v24 = vadd.f32 %v2249_v47, %v2195_v40  ;;  %v2327_v26 = vadd.f32 %v765_v28, %v2209_v9 }
 0x139   : > { %v2287_v31 = vpop.f32.mrb[23].mxu0  ;;  %v1706_v8 = vpop.eup %1705  ;;  %v1171_v33 = vadd.f32 1.0, %v1704_v29  ;;  %1725 = vpow2.f32 %v1065_v13  ;;  %v982_v13 = vsub.f32 0.0, %v2302_v50 }
 0x13a   : > { %v2291_v35 = vpop.f32.mrb[23].mxu1  ;;  %v1708_v36 = vpop.eup %1707  ;;  %v1170_v37 = vadd.f32 1.0, %v1706_v8  ;;  %1727 = vpow2.f32 %v1069_v18  ;;  %v805_v8 = vadd.f32 %v2253_v51, %v2195_v40  ;;  %v2338_v47 = vadd.f32 %v2287_v31, %v2209_v9 }
 0x13b   : > { %v1710_v38 = vpop.eup %1709  ;;  %1729 = vrcp.f32 %v1171_v33  ;;  %v1172_v39 = vadd.f32 1.0, %v1708_v36  ;;  %v2304_v53 = vpop.f32.mrb[24].mxu0  ;;  %v2332_v33 = vadd.f32 %v818_v30, %v2209_v9  ;;  %v807_v51 = vadd.f32 %v2258_v56, %v2195_v40 }
 0x13c   : > { %v1712_v45 = vpop.eup %1711  ;;  %1731 = vrcp.f32 %v1170_v37  ;;  %v1125_v46 = vadd.f32 1.0, %v1710_v38  ;;  %v2306_v59 = vpop.f32.mrb[24].mxu1  ;;  %v754_v37 = vadd.f32 %v2255_v52, %v2195_v40  ;;  %v984_v38 = vsub.f32 0.0, %v715_v5 }
 0x13d   : > { %v1714_v15 = vpop.eup %1713  ;;  %1733 = vrcp.f32 %v1172_v39  ;;  %v1127_v48 = vadd.f32 1.0, %v1712_v45  ;;  %v2308_v60 = vpop.f32.mrb[25].mxu0  ;;  %v937_v42 = vsub.f32 0.0, %v752_v24  ;;  %v756_v52 = vadd.f32 %v2260_v57, %v2197_v41 }
 0x13e   : > { %v1716_v54 = vpop.eup %1715  ;;  %1735 = vrcp.f32 %v1125_v46  ;;  %v1126_v55 = vadd.f32 1.0, %v1714_v15  ;;  %v2310_v1 = vpop.f32.mrb[25].mxu1  ;;  %v2349_v31 = vadd.f32 %v2291_v35, %v2209_v9  ;;  %v1101_v56 = vmul.f32 1.442695, %v983_v4 }
 0x13f   : > { %v1718_v20 = vpop.eup %1717  ;;  %1737 = vrcp.f32 %v1127_v48  ;;  %v1128_v63 = vadd.f32 1.0, %v1716_v54  ;;  %v2312_v2 = vpop.f32.mrb[26].mxu0  ;;  %v939_v15 = vsub.f32 0.0, %v805_v8  ;;  %v809_v48 = vadd.f32 %v2263_v61, %v2197_v41 }
 0x140   : > { %v1720_v21 = vpop.eup %1719  ;;  %1739 = vrcp.f32 %v1126_v55  ;;  %v1141_v3 = vadd.f32 1.0, %v1718_v20  ;;  %v2317_v6 = vpop.f32.mrb[26].mxu1  ;;  %v1099_v35 = vmul.f32 1.442695, %v982_v13  ;;  %v938_v54 = vsub.f32 0.0, %v754_v37 }
 0x141   : > { %v2319_v7 = vpop.f32.mrb[27].mxu0  ;;  %v1722_v10 = vpop.eup %1721  ;;  %1741 = vrcp.f32 %v1128_v63  ;;  %v1143_v11 = vadd.f32 1.0, %v1720_v21  ;;  %v758_v55 = vadd.f32 %v2265_v62, %v2197_v41  ;;  %v1103_v61 = vmul.f32 1.442695, %v984_v38 }
 0x142   : > { %v2322_v17 = vpop.f32.mrb[27].mxu1  ;;  %v1724_v18 = vpop.eup %1723  ;;  %1743 = vrcp.f32 %v1141_v3  ;;  %v1142_v19 = vadd.f32 1.0, %v1722_v10  ;;  %v940_v3 = vsub.f32 0.0, %v807_v51  ;;  %v953_v10 = vsub.f32 0.0, %v756_v52 }
 0x143   : > { %v1726_v25 = vpop.eup %1725  ;;  %1745 = vrcp.f32 %v1143_v11  ;;  %v1144_v29 = vadd.f32 1.0, %v1724_v18  ;;  %v2342_v30 = vpop.f32.mrb[28].mxu0  ;;  %v2371_v62 = vadd.f32 %v2312_v2, %v2197_v41  ;;  %v955_v13 = vsub.f32 0.0, %v809_v48 }
 0x144   : > { %v1728_v34 = vpop.eup %1727  ;;  %1747 = vrcp.f32 %v1142_v19  ;;  %v1157_v36 = vadd.f32 1.0, %v1726_v25  ;;  %v2351_v45 = vpop.f32.mrb[28].mxu1  ;;  %v1011_v19 = vmul.f32 1.442695, %v938_v54  ;;  %v954_v24 = vsub.f32 0.0, %v758_v55 }
 0x145   : > { %v1730_v28 = vpop.eup %1729  ;;  %1749 = vrcp.f32 %v1144_v29  ;;  %v1159_v14 = vadd.f32 1.0, %v1728_v34  ;;  %v2353_v46 = vpop.f32.mrb[29].mxu0  ;;  %v1015_v2 = vmul.f32 1.442695, %v940_v3  ;;  %v2382_v29 = vadd.f32 %v2319_v7, %v2197_v41 }
 0x146   : > { %v1732_v39 = vpop.eup %1731  ;;  %1299 = vst [vmem:[%s2243_s12 + $0x190] sm:$0xff] %v1730_v28  ;;  %1751 = vrcp.f32 %v1157_v36  ;;  %v2358_v49 = vpop.f32.mrb[29].mxu1  ;;  %v2386_v8 = vadd.f32 %v2322_v17, %v2197_v41  ;;  %v1045_v37 = vmul.f32 1.442695, %v955_v13 }
 0x147   : > { %v1734_v32 = vpop.eup %1733  ;;  %1298 = vst [vmem:[%s2243_s12 + $0x188] sm:$0xff] %v1732_v39  ;;  %1753 = vrcp.f32 %v1159_v14  ;;  %v871_v57 = vpop.f32.mrb[30].mxu0  ;;  %v1043_v14 = vmul.f32 1.442695, %v954_v24 }
 0x148   : > { %v1736_v50 = vpop.eup %1735  ;;  %1300 = vst [vmem:[%s2243_s12 + $0x198] sm:$0xff] %v1734_v32  ;;  %1755 = vpow2.f32 %v1067_v58  ;;  %v924_v20 = vpop.f32.mrb[30].mxu1  ;;  %v1009_v58 = vmul.f32 1.442695, %v937_v42  ;;  %v2394_v51 = vadd.f32 %v871_v57, %v2209_v9 }
 0x149   : > { %v2363_v63 = vpop.f32.mrb[31].mxu0  ;;  %v1738_v21 = vpop.eup %1737  ;;  %1253 = vst [vmem:[%s2243_s12 + $0x20] sm:$0xff] %v1736_v50  ;;  %1757 = vpow2.f32 %v1071_v0  ;;  %v1013_v0 = vmul.f32 1.442695, %v939_v15  ;;  %v762_v50 = vadd.f32 %v2272_v16, %v2199_v43 }
 0x14a   : > { %v2366_v4 = vpop.f32.mrb[31].mxu1  ;;  %v1740_v5 = vpop.eup %1739  ;;  %1255 = vst [vmem:[%s2243_s12 + $0x30] sm:$0xff] %v1738_v21  ;;  %1759 = vpow2.f32 %v1097_v12  ;;  %v2377_v12 = vadd.f32 %v2317_v6, %v2197_v41  ;;  %v1041_v6 = vmul.f32 1.442695, %v953_v10 }
 0x14b   : > { %v1742_v11 = vpop.eup %1741  ;;  %1254 = vst [vmem:[%s2243_s12 + $0x28] sm:$0xff] %v1740_v5  ;;  %1761 = vpow2.f32 %v1101_v56  ;;  %v2397_v56 = vadd.f32 %v924_v20, %v2209_v9  ;;  %v815_v20 = vadd.f32 %v2277_v22, %v2199_v43  ;;  %v956_v5 = vsub.f32 0.0, %v2294_v44 }
 0x14c   : > { %v1744_v18 = vpop.eup %1743  ;;  %1256 = vst [vmem:[%s2243_s12 + $0x38] sm:$0xff] %v1742_v11  ;;  %1763 = vpow2.f32 %v1099_v35  ;;  %v2403_v35 = vadd.f32 %v2363_v63, %v2209_v9  ;;  %v764_v63 = vadd.f32 %v2279_v23, %v2199_v43  ;;  %v969_v11 = vsub.f32 0.0, %v762_v50 }
 0x14d   : > { %v1746_v25 = vpop.eup %1745  ;;  %1269 = vst [vmem:[%s2243_s12 + $0xa0] sm:$0xff] %v1744_v18  ;;  %1765 = vpow2.f32 %v1103_v61  ;;  %v2409_v61 = vadd.f32 %v2366_v4, %v2209_v9  ;;  %v971_v18 = vsub.f32 0.0, %v815_v20  ;;  %v1047_v24 = vmul.f32 1.442695, %v956_v5 }
 0x14e   : > { %v1748_v34 = vpop.eup %1747  ;;  %1271 = vst [vmem:[%s2243_s12 + $0xb0] sm:$0xff] %v1746_v25  ;;  %1767 = vpow2.f32 %v1009_v58  ;;  %v970_v23 = vsub.f32 0.0, %v764_v63 }
 0x14f   : > { %v1750_v36 = vpop.eup %1749  ;;  %1270 = vst [vmem:[%s2243_s12 + $0xa8] sm:$0xff] %v1748_v34  ;;  %1769 = vpow2.f32 %v1013_v0  ;;  %v817_v0 = vadd.f32 %v2284_v27, %v2199_v43  ;;  %v1073_v34 = vmul.f32 1.442695, %v969_v11 }
 0x150   : > { %v1752_v28 = vpop.eup %1751  ;;  %1272 = vst [vmem:[%s2243_s12 + $0xb8] sm:$0xff] %v1750_v36  ;;  %1771 = vpow2.f32 %v1011_v19 }
 0x151   : > { %v1754_v38 = vpop.eup %1753  ;;  %1285 = vst [vmem:[%s2243_s12 + $0x120] sm:$0xff] %v1752_v28  ;;  %1773 = vpow2.f32 %v1015_v2  ;;  %v858_v28 = vadd.f32 %v2304_v53, %v2195_v40  ;;  %v860_v53 = vadd.f32 %v2308_v60, %v2195_v40 }
 0x152   : > { %v1756_v7 = vpop.eup %1755  ;;  %1287 = vst [vmem:[%s2243_s12 + $0x130] sm:$0xff] %v1754_v38  ;;  %1775 = vpow2.f32 %v1041_v6  ;;  %v972_v6 = vsub.f32 0.0, %v817_v0  ;;  %v1077_v38 = vmul.f32 1.442695, %v971_v18 }
 0x153   : > { %v1758_v41 = vpop.eup %1757  ;;  %v1158_v17 = vadd.f32 1.0, %v1756_v7  ;;  %1777 = vpow2.f32 %v1045_v37  ;;  %v985_v37 = vsub.f32 0.0, %v2327_v26  ;;  %v987_v7 = vsub.f32 0.0, %v2332_v33 }
 0x154   : > { %v1760_v39 = vpop.eup %1759  ;;  %v1160_v42 = vadd.f32 1.0, %v1758_v41  ;;  %1779 = vpow2.f32 %v1043_v14  ;;  %v911_v41 = vadd.f32 %v2306_v59, %v2195_v40  ;;  %v986_v26 = vsub.f32 0.0, %v2338_v47 }
 0x155   : > { %v1762_v52 = vpop.eup %1761  ;;  %1781 = vrcp.f32 %v1158_v17  ;;  %v1173_v32 = vadd.f32 1.0, %v1760_v39  ;;  %v1075_v39 = vmul.f32 1.442695, %v970_v23  ;;  %v988_v33 = vsub.f32 0.0, %v2349_v31 }
 0x156   : > { %v1764_v15 = vpop.eup %1763  ;;  %1783 = vrcp.f32 %v1160_v42  ;;  %v1175_v48 = vadd.f32 1.0, %v1762_v52  ;;  %v1079_v52 = vmul.f32 1.442695, %v972_v6  ;;  %v913_v59 = vadd.f32 %v2310_v1, %v2195_v40 }
 0x157   : > { %v1766_v57 = vpop.eup %1765  ;;  %1785 = vrcp.f32 %v1173_v32  ;;  %v1174_v54 = vadd.f32 1.0, %v1764_v15  ;;  %v1105_v15 = vmul.f32 1.442695, %v985_v37  ;;  %v1109_v60 = vmul.f32 1.442695, %v987_v7 }
 0x158   : > { %v1768_v55 = vpop.eup %1767  ;;  %1787 = vrcp.f32 %v1175_v48  ;;  %v1176_v21 = vadd.f32 1.0, %v1766_v57  ;;  %v941_v48 = vsub.f32 0.0, %v858_v28  ;;  %v943_v50 = vsub.f32 0.0, %v911_v41 }
 0x159   : > { %v1770_v3 = vpop.eup %1769  ;;  %1789 = vrcp.f32 %v1174_v54  ;;  %v1129_v16 = vadd.f32 1.0, %v1768_v55  ;;  %v1107_v31 = vmul.f32 1.442695, %v986_v26  ;;  %v942_v54 = vsub.f32 0.0, %v860_v53 }
 0x15a   : > { %v1772_v58 = vpop.eup %1771  ;;  %1791 = vrcp.f32 %v1176_v21  ;;  %v1131_v10 = vadd.f32 1.0, %v1770_v3  ;;  %v1111_v1 = vmul.f32 1.442695, %v988_v33  ;;  %v944_v55 = vsub.f32 0.0, %v913_v59 }
 0x15b   : > { %v1774_v22 = vpop.eup %1773  ;;  %1793 = vrcp.f32 %v1129_v16  ;;  %v1130_v13 = vadd.f32 1.0, %v1772_v58  ;;  %v1017_v20 = vmul.f32 1.442695, %v941_v48  ;;  %v1021_v16 = vmul.f32 1.442695, %v943_v50 }
 0x15c   : > { %v1776_v9 = vpop.eup %1775  ;;  %1795 = vrcp.f32 %v1131_v10  ;;  %v1132_v4 = vadd.f32 1.0, %v1774_v22  ;;  %v1019_v63 = vmul.f32 1.442695, %v942_v54  ;;  %v1023_v10 = vmul.f32 1.442695, %v944_v55 }
 0x15d   : > { %v1778_v19 = vpop.eup %1777  ;;  %1797 = vrcp.f32 %v1130_v13  ;;  %v1145_v44 = vadd.f32 1.0, %v1776_v9  ;;  %v957_v28 = vsub.f32 0.0, %v2371_v62  ;;  %v959_v41 = vsub.f32 0.0, %v2377_v12 }
 0x15e   : > { %v1780_v25 = vpop.eup %1779  ;;  %1799 = vrcp.f32 %v1132_v4  ;;  %v1147_v2 = vadd.f32 1.0, %v1778_v19  ;;  %v958_v53 = vsub.f32 0.0, %v2382_v29  ;;  %v923_v12 = vadd.f32 %v2358_v49, %v2199_v43 }
 0x15f   : > { %v1782_v27 = vpop.eup %1781  ;;  %1801 = vrcp.f32 %v1145_v44  ;;  %v1146_v36 = vadd.f32 1.0, %v1780_v25  ;;  %v1049_v59 = vmul.f32 1.442695, %v957_v28  ;;  %v989_v54 = vsub.f32 0.0, %v2394_v51 }
 0x160   : > { %v1784_v14 = vpop.eup %1783  ;;  %1286 = vst [vmem:[%s2243_s12 + $0x128] sm:$0xff] %v1782_v27  ;;  %1803 = vrcp.f32 %v1147_v2  ;;  %v976_v49 = vsub.f32 0.0, %v923_v12  ;;  %v991_v55 = vsub.f32 0.0, %v2397_v56 }
 0x161   : > { %v1786_v17 = vpop.eup %1785  ;;  %1288 = vst [vmem:[%s2243_s12 + $0x138] sm:$0xff] %v1784_v14  ;;  %1805 = vrcp.f32 %v1146_v36  ;;  %v868_v14 = vadd.f32 %v2342_v30, %v2199_v43  ;;  %v1113_v56 = vmul.f32 1.442695, %v989_v54 }
 0x162   : > { %v1788_v42 = vpop.eup %1787  ;;  %1301 = vst [vmem:[%s2243_s12 + $0x1a0] sm:$0xff] %v1786_v17  ;;  %1807 = vpow2.f32 %v1047_v24  ;;  %v921_v17 = vadd.f32 %v2351_v45, %v2199_v43  ;;  %v1087_v51 = vmul.f32 1.442695, %v976_v49  ;;  %v1347_v49 = vld [vmem:[%s2243_s12 + $0x28] sm:$0xff] (%p2003_p6) }
 0x163   : > { %v1790_v32 = vpop.eup %1789  ;;  %1303 = vst [vmem:[%s2243_s12 + $0x1b0] sm:$0xff] %v1788_v42  ;;  %1809 = vpow2.f32 %v1073_v34  ;;  %v870_v42 = vadd.f32 %v2353_v46, %v2199_v43  ;;  %v1053_v46 = vmul.f32 1.442695, %v959_v41  ;;  %1348 = vst [vmem:[%s2491_s30 + $0x28] sm:$0xff] (%p2003_p6), %v1347_v49 }
 0x164   : > { %v1792_v47 = vpop.eup %1791  ;;  %1302 = vst [vmem:[%s2243_s12 + $0x1a8] sm:$0xff] %v1790_v32  ;;  %1811 = vpow2.f32 %v1077_v38  ;;  %v973_v32 = vsub.f32 0.0, %v868_v14  ;;  %v975_v48 = vsub.f32 0.0, %v921_v17 }
 0x165   : > { %v1794_v57 = vpop.eup %1793  ;;  %1304 = vst [vmem:[%s2243_s12 + $0x1b8] sm:$0xff] %v1792_v47  ;;  %1813 = vpow2.f32 %v1075_v39 }
 0x166   : > { %v1796_v40 = vpop.eup %1795  ;;  %1257 = vst [vmem:[%s2243_s12 + $0x40] sm:$0xff] %v1794_v57  ;;  %1815 = vpow2.f32 %v1079_v52  ;;  %v960_v52 = vsub.f32 0.0, %v2386_v8  ;;  %v1051_v8 = vmul.f32 1.442695, %v958_v53 }
 0x167   : > { %v1798_v21 = vpop.eup %1797  ;;  %1259 = vst [vmem:[%s2243_s12 + $0x50] sm:$0xff] %v1796_v40  ;;  %1817 = vpow2.f32 %v1105_v15 }
 0x168   : > { %v1800_v3 = vpop.eup %1799  ;;  %1258 = vst [vmem:[%s2243_s12 + $0x48] sm:$0xff] %v1798_v21  ;;  %1819 = vpow2.f32 %v1109_v60  ;;  %v974_v60 = vsub.f32 0.0, %v870_v42  ;;  %v1055_v43 = vmul.f32 1.442695, %v960_v52 }
 0x169   : > { %v1802_v5 = vpop.eup %1801  ;;  %1260 = vst [vmem:[%s2243_s12 + $0x58] sm:$0xff] %v1800_v3  ;;  %1821 = vpow2.f32 %v1107_v31  ;;  %v1081_v31 = vmul.f32 1.442695, %v973_v32  ;;  %v990_v3 = vsub.f32 0.0, %v2403_v35 }
 0x16a   : > { %v1804_v58 = vpop.eup %1803  ;;  %1273 = vst [vmem:[%s2243_s12 + $0xc0] sm:$0xff] %v1802_v5  ;;  %1823 = vpow2.f32 %v1111_v1  ;;  %v1085_v1 = vmul.f32 1.442695, %v975_v48  ;;  %v992_v5 = vsub.f32 0.0, %v2409_v61 }
 0x16b   : > { %v1806_v11 = vpop.eup %1805  ;;  %1275 = vst [vmem:[%s2243_s12 + $0xd0] sm:$0xff] %v1804_v58  ;;  %1825 = vpow2.f32 %v1017_v20  ;;  %v1083_v20 = vmul.f32 1.442695, %v974_v60  ;;  %v1115_v35 = vmul.f32 1.442695, %v990_v3  ;;  %v1341_v60 = vld [vmem:[%s2243_s12 + $0x10] sm:$0xff] (%p2003_p6) }
 0x16c   : > { %v1808_v0 = vpop.eup %1807  ;;  %1274 = vst [vmem:[%s2243_s12 + $0xc8] sm:$0xff] %v1806_v11  ;;  %1827 = vpow2.f32 %v1021_v16  ;;  %1342 = vst [vmem:[%s2491_s30 + $0x10] sm:$0xff] (%p2003_p6), %v1341_v60 }
 0x16d   : > { %v1810_v22 = vpop.eup %1809  ;;  %v1148_v13 = vadd.f32 1.0, %v1808_v0  ;;  %1829 = vpow2.f32 %v1019_v63  ;;  %v1353_v54 = vld [vmem:[%s2243_s12 + $0x40] sm:$0xff] (%p2003_p6) }
 0x16e   : > { %v1812_v9 = vpop.eup %1811  ;;  %v1161_v4 = vadd.f32 1.0, %v1810_v22  ;;  %1831 = vpow2.f32 %v1023_v10  ;;  %v1117_v10 = vmul.f32 1.442695, %v991_v55  ;;  %v1119_v22 = vmul.f32 1.442695, %v992_v5  ;;  %1354 = vst [vmem:[%s2491_s30 + $0x40] sm:$0xff] (%p2003_p6), %v1353_v54 }
 0x16f   : > { %v1814_v18 = vpop.eup %1813  ;;  %1833 = vrcp.f32 %v1148_v13  ;;  %v1163_v19 = vadd.f32 1.0, %v1812_v9  ;;  %v1371_v5 = vld [vmem:[%s2243_s12 + $0x88] sm:$0xff] (%p2003_p6) }
 0x170   : > { %v1816_v44 = vpop.eup %1815  ;;  %1835 = vrcp.f32 %v1161_v4  ;;  %v1162_v24 = vadd.f32 1.0, %v1814_v18  ;;  %v1359_v55 = vld [vmem:[%s2243_s12 + $0x58] sm:$0xff] (%p2003_p6)  ;;  %1372 = vst [vmem:[%s2491_s30 + $0x108] sm:$0xff] (%p2003_p6), %v1371_v5 }
 0x171   : > { %v1818_v23 = vpop.eup %1817  ;;  %1837 = vrcp.f32 %v1163_v19  ;;  %v1164_v25 = vadd.f32 1.0, %v1816_v44  ;;  %1360 = vst [vmem:[%s2491_s30 + $0x58] sm:$0xff] (%p2003_p6), %v1359_v55 }
 0x172   : > { %v1820_v2 = vpop.eup %1819  ;;  %1839 = vrcp.f32 %v1162_v24  ;;  %v1177_v34 = vadd.f32 1.0, %v1818_v23 }
 0x173   : > { %v1822_v6 = vpop.eup %1821  ;;  %1841 = vrcp.f32 %v1164_v25  ;;  %v1179_v27 = vadd.f32 1.0, %v1820_v2 }
 0x174   : > { %v1824_v36 = vpop.eup %1823  ;;  %1843 = vrcp.f32 %v1177_v34  ;;  %v1178_v37 = vadd.f32 1.0, %v1822_v6 }
 0x175   : > { %v1826_v38 = vpop.eup %1825  ;;  %1845 = vrcp.f32 %v1179_v27  ;;  %v1180_v7 = vadd.f32 1.0, %v1824_v36 }
 0x176   : > { %v1828_v39 = vpop.eup %1827  ;;  %1847 = vrcp.f32 %v1178_v37  ;;  %v1133_v26 = vadd.f32 1.0, %v1826_v38 }
 0x177   : > { %v1830_v62 = vpop.eup %1829  ;;  %1849 = vrcp.f32 %v1180_v7  ;;  %v1135_v30 = vadd.f32 1.0, %v1828_v39 }
 0x178   : > { %v1832_v33 = vpop.eup %1831  ;;  %1851 = vrcp.f32 %v1133_v26  ;;  %v1134_v45 = vadd.f32 1.0, %v1830_v62 }
 0x179   : > { %v1834_v15 = vpop.eup %1833  ;;  %1853 = vrcp.f32 %v1135_v30  ;;  %v1136_v29 = vadd.f32 1.0, %v1832_v33 }
 0x17a   : > { %v1836_v47 = vpop.eup %1835  ;;  %1276 = vst [vmem:[%s2243_s12 + $0xd8] sm:$0xff] %v1834_v15  ;;  %1855 = vrcp.f32 %v1134_v45 }
 0x17b   : > { %v1838_v50 = vpop.eup %1837  ;;  %1289 = vst [vmem:[%s2243_s12 + $0x140] sm:$0xff] %v1836_v47  ;;  %1857 = vrcp.f32 %v1136_v29  ;;  %v1337_v47 = vld [vmem:[%s2243_s12] sm:$0xff] (%p2003_p6) }
 0x17c   : > { %v1840_v57 = vpop.eup %1839  ;;  %1291 = vst [vmem:[%s2243_s12 + $0x150] sm:$0xff] %v1838_v50  ;;  %1859 = vpow2.f32 %v1049_v59  ;;  %v1343_v50 = vld [vmem:[%s2243_s12 + $0x18] sm:$0xff] (%p2003_p6)  ;;  %1338 = vst [vmem:[%s2491_s30] sm:$0xff] (%p2003_p6), %v1337_v47 }
 0x17d   : > { %v1842_v40 = vpop.eup %1841  ;;  %1290 = vst [vmem:[%s2243_s12 + $0x148] sm:$0xff] %v1840_v57  ;;  %1861 = vpow2.f32 %v1053_v46  ;;  %1344 = vst [vmem:[%s2491_s30 + $0x18] sm:$0xff] (%p2003_p6), %v1343_v50  ;;  %v1349_v57 = vld [vmem:[%s2243_s12 + $0x30] sm:$0xff] (%p2003_p6) }
 0x17e   : > { %v1844_v21 = vpop.eup %1843  ;;  %1292 = vst [vmem:[%s2243_s12 + $0x158] sm:$0xff] %v1842_v40  ;;  %1863 = vpow2.f32 %v1051_v8  ;;  %v1339_v8 = vld [vmem:[%s2243_s12 + $0x8] sm:$0xff] (%p2003_p6)  ;;  %1350 = vst [vmem:[%s2491_s30 + $0x30] sm:$0xff] (%p2003_p6), %v1349_v57 }
 0x17f   : > { %v1846_v16 = vpop.eup %1845  ;;  %1305 = vst [vmem:[%s2243_s12 + $0x1c0] sm:$0xff] %v1844_v21  ;;  %1865 = vpow2.f32 %v1055_v43  ;;  %v1345_v43 = vld [vmem:[%s2243_s12 + $0x20] sm:$0xff] (%p2003_p6)  ;;  %1340 = vst [vmem:[%s2491_s30 + $0x8] sm:$0xff] (%p2003_p6), %v1339_v8  ;;  %v1355_v40 = vld [vmem:[%s2243_s12 + $0x48] sm:$0xff] (%p2003_p6) }
 0x180   : > { %v1848_v63 = vpop.eup %1847  ;;  %1307 = vst [vmem:[%s2243_s12 + $0x1d0] sm:$0xff] %v1846_v16  ;;  %1867 = vpow2.f32 %v1081_v31  ;;  %1346 = vst [vmem:[%s2491_s30 + $0x20] sm:$0xff] (%p2003_p6), %v1345_v43  ;;  %v1351_v31 = vld [vmem:[%s2243_s12 + $0x38] sm:$0xff] (%p2003_p6) }
 0x181   : > { %v1850_v58 = vpop.eup %1849  ;;  %1306 = vst [vmem:[%s2243_s12 + $0x1c8] sm:$0xff] %v1848_v63  ;;  %1869 = vpow2.f32 %v1085_v1  ;;  %1352 = vst [vmem:[%s2491_s30 + $0x38] sm:$0xff] (%p2003_p6), %v1351_v31  ;;  %v1357_v1 = vld [vmem:[%s2243_s12 + $0x50] sm:$0xff] (%p2003_p6) }
 0x182   : > { %v1852_v11 = vpop.eup %1851  ;;  %1308 = vst [vmem:[%s2243_s12 + $0x1d8] sm:$0xff] %v1850_v58  ;;  %1871 = vpow2.f32 %v1083_v20  ;;  %1356 = vst [vmem:[%s2491_s30 + $0x48] sm:$0xff] (%p2003_p6), %v1355_v40  ;;  %v1373_v63 = vld [vmem:[%s2243_s12 + $0x90] sm:$0xff] (%p2003_p6)  ;;  %v1377_v58 = vld [vmem:[%s2243_s12 + $0xa0] sm:$0xff] (%p2003_p6) }
 0x183   : > { %v1854_v0 = vpop.eup %1853  ;;  %1261 = vst [vmem:[%s2243_s12 + $0x60] sm:$0xff] %v1852_v11  ;;  %1873 = vpow2.f32 %v1087_v51  ;;  %1358 = vst [vmem:[%s2491_s30 + $0x50] sm:$0xff] (%p2003_p6), %v1357_v1  ;;  %v1369_v51 = vld [vmem:[%s2243_s12 + $0x80] sm:$0xff] (%p2003_p6)  ;;  %v1381_v11 = vld [vmem:[%s2243_s12 + $0xb0] sm:$0xff] (%p2003_p6) }
 0x184   : > { %v1856_v61 = vpop.eup %1855  ;;  %1263 = vst [vmem:[%s2243_s12 + $0x70] sm:$0xff] %v1854_v0  ;;  %1875 = vpow2.f32 %v1113_v56  ;;  %1370 = vst [vmem:[%s2491_s30 + $0x100] sm:$0xff] (%p2003_p6), %v1369_v51  ;;  %v1375_v56 = vld [vmem:[%s2243_s12 + $0x98] sm:$0xff] (%p2003_p6)  ;;  %v1385_v0 = vld [vmem:[%s2243_s12 + $0xc0] sm:$0xff] (%p2003_p6) }
 0x185   : > { %v1858_v13 = vpop.eup %1857  ;;  %1262 = vst [vmem:[%s2243_s12 + $0x68] sm:$0xff] %v1856_v61  ;;  %1877 = vpow2.f32 %v1117_v10  ;;  %1374 = vst [vmem:[%s2491_s30 + $0x110] sm:$0xff] (%p2003_p6), %v1373_v63  ;;  %v1379_v10 = vld [vmem:[%s2243_s12 + $0xa8] sm:$0xff] (%p2003_p6)  ;;  %v1389_v61 = vld [vmem:[%s2243_s12 + $0xd0] sm:$0xff] (%p2003_p6) }
 0x186   : > { %v1860_v9 = vpop.eup %1859  ;;  %1264 = vst [vmem:[%s2243_s12 + $0x78] sm:$0xff] %v1858_v13  ;;  %1879 = vpow2.f32 %v1115_v35  ;;  %1376 = vst [vmem:[%s2491_s30 + $0x118] sm:$0xff] (%p2003_p6), %v1375_v56  ;;  %v1383_v35 = vld [vmem:[%s2243_s12 + $0xb8] sm:$0xff] (%p2003_p6) }
 0x187   : > { %v1862_v4 = vpop.eup %1861  ;;  %v1149_v18 = vadd.f32 1.0, %v1860_v9  ;;  %1881 = vpow2.f32 %v1119_v22  ;;  %1378 = vst [vmem:[%s2491_s30 + $0x120] sm:$0xff] (%p2003_p6), %v1377_v58  ;;  %1380 = vst [vmem:[%s2491_s30 + $0x128] sm:$0xff] (%p2003_p6), %v1379_v10  ;;  %v1387_v22 = vld [vmem:[%s2243_s12 + $0xc8] sm:$0xff] (%p2003_p6)  ;;  %v1391_v13 = vld [vmem:[%s2243_s12 + $0xd8] sm:$0xff] (%p2003_p6) }
 0x188   : > { %v1864_v19 = vpop.eup %1863  ;;  %v1151_v44 = vadd.f32 1.0, %v1862_v4  ;;  %1382 = vst [vmem:[%s2491_s30 + $0x130] sm:$0xff] (%p2003_p6), %v1381_v11  ;;  %1384 = vst [vmem:[%s2491_s30 + $0x138] sm:$0xff] (%p2003_p6), %v1383_v35 }
 0x189   : > { %v1866_v24 = vpop.eup %1865  ;;  %1883 = vrcp.f32 %v1149_v18  ;;  %v1150_v23 = vadd.f32 1.0, %v1864_v19  ;;  %1386 = vst [vmem:[%s2491_s30 + $0x140] sm:$0xff] (%p2003_p6), %v1385_v0  ;;  %1388 = vst [vmem:[%s2491_s30 + $0x148] sm:$0xff] (%p2003_p6), %v1387_v22 }
 0x18a   : > { %v1868_v25 = vpop.eup %1867  ;;  %1885 = vrcp.f32 %v1151_v44  ;;  %v1152_v2 = vadd.f32 1.0, %v1866_v24  ;;  %v1361_v21 = vld [vmem:[%s2243_s12 + $0x60] sm:$0xff] (%p2003_p6)  ;;  %1390 = vst [vmem:[%s2491_s30 + $0x150] sm:$0xff] (%p2003_p6), %v1389_v61  ;;  %1392 = vst [vmem:[%s2491_s30 + $0x158] sm:$0xff] (%p2003_p6), %v1391_v13  ;;  %v1403_v24 = vld [vmem:[%s2243_s12 + $0x108] sm:$0xff] (%p2003_p6) }
 0x18b   : > { %v1870_v34 = vpop.eup %1869  ;;  %1887 = vrcp.f32 %v1150_v23  ;;  %v1165_v6 = vadd.f32 1.0, %v1868_v25  ;;  %v1365_v3 = vld [vmem:[%s2243_s12 + $0x70] sm:$0xff] (%p2003_p6)  ;;  %1362 = vst [vmem:[%s2491_s30 + $0x60] sm:$0xff] (%p2003_p6), %v1361_v21  ;;  %v1401_v44 = vld [vmem:[%s2243_s12 + $0x100] sm:$0xff] (%p2003_p6)  ;;  %v1407_v25 = vld [vmem:[%s2243_s12 + $0x118] sm:$0xff] (%p2003_p6) }
 0x18c   : > { %v1872_v27 = vpop.eup %1871  ;;  %1889 = vrcp.f32 %v1152_v2  ;;  %v1167_v36 = vadd.f32 1.0, %v1870_v34  ;;  %v1363_v20 = vld [vmem:[%s2243_s12 + $0x68] sm:$0xff] (%p2003_p6)  ;;  %1366 = vst [vmem:[%s2491_s30 + $0x70] sm:$0xff] (%p2003_p6), %v1365_v3  ;;  %1402 = vst [vmem:[%s2491_s30 + $0x200] sm:$0xff] (%p2003_p6), %v1401_v44  ;;  %v1405_v23 = vld [vmem:[%s2243_s12 + $0x110] sm:$0xff] (%p2003_p6) }
 0x18d   : > { %v1874_v37 = vpop.eup %1873  ;;  %1891 = vrcp.f32 %v1165_v6  ;;  %v1166_v28 = vadd.f32 1.0, %v1872_v27  ;;  %1364 = vst [vmem:[%s2491_s30 + $0x68] sm:$0xff] (%p2003_p6), %v1363_v20  ;;  %v1367_v16 = vld [vmem:[%s2243_s12 + $0x78] sm:$0xff] (%p2003_p6)  ;;  %1404 = vst [vmem:[%s2491_s30 + $0x208] sm:$0xff] (%p2003_p6), %v1403_v24  ;;  %v1409_v2 = vld [vmem:[%s2243_s12 + $0x120] sm:$0xff] (%p2003_p6) }
 0x18e   : > { %v1876_v14 = vpop.eup %1875  ;;  %1893 = vrcp.f32 %v1167_v36  ;;  %v1168_v38 = vadd.f32 1.0, %v1874_v37  ;;  %1368 = vst [vmem:[%s2491_s30 + $0x78] sm:$0xff] (%p2003_p6), %v1367_v16  ;;  %1406 = vst [vmem:[%s2491_s30 + $0x210] sm:$0xff] (%p2003_p6), %v1405_v23  ;;  %v1411_v34 = vld [vmem:[%s2243_s12 + $0x128] sm:$0xff] (%p2003_p6)  ;;  %v1413_v6 = vld [vmem:[%s2243_s12 + $0x130] sm:$0xff] (%p2003_p6) }
 0x18f   : > { %v1878_v7 = vpop.eup %1877  ;;  %1895 = vrcp.f32 %v1166_v28  ;;  %v1181_v41 = vadd.f32 1.0, %v1876_v14  ;;  %1408 = vst [vmem:[%s2491_s30 + $0x218] sm:$0xff] (%p2003_p6), %v1407_v25  ;;  %1410 = vst [vmem:[%s2491_s30 + $0x220] sm:$0xff] (%p2003_p6), %v1409_v2  ;;  %v1415_v27 = vld [vmem:[%s2243_s12 + $0x138] sm:$0xff] (%p2003_p6)  ;;  %v1417_v36 = vld [vmem:[%s2243_s12 + $0x140] sm:$0xff] (%p2003_p6) }
 0x190   : > { %v1880_v17 = vpop.eup %1879  ;;  %1897 = vrcp.f32 %v1168_v38  ;;  %v1183_v39 = vadd.f32 1.0, %v1878_v7  ;;  %1412 = vst [vmem:[%s2491_s30 + $0x228] sm:$0xff] (%p2003_p6), %v1411_v34  ;;  %1414 = vst [vmem:[%s2491_s30 + $0x230] sm:$0xff] (%p2003_p6), %v1413_v6  ;;  %v1419_v37 = vld [vmem:[%s2243_s12 + $0x148] sm:$0xff] (%p2003_p6)  ;;  %v1421_v28 = vld [vmem:[%s2243_s12 + $0x150] sm:$0xff] (%p2003_p6) }
 0x191   : > { %v1882_v26 = vpop.eup %1881  ;;  %1899 = vrcp.f32 %v1181_v41  ;;  %v1182_v53 = vadd.f32 1.0, %v1880_v17  ;;  %1416 = vst [vmem:[%s2491_s30 + $0x238] sm:$0xff] (%p2003_p6), %v1415_v27  ;;  %1418 = vst [vmem:[%s2491_s30 + $0x240] sm:$0xff] (%p2003_p6), %v1417_v36  ;;  %v1423_v14 = vld [vmem:[%s2243_s12 + $0x158] sm:$0xff] (%p2003_p6) }
 0x192   : > { %1901 = vrcp.f32 %v1183_v39  ;;  %v1184_v42 = vadd.f32 1.0, %v1882_v26  ;;  %1420 = vst [vmem:[%s2491_s30 + $0x248] sm:$0xff] (%p2003_p6), %v1419_v37  ;;  %1422 = vst [vmem:[%s2491_s30 + $0x250] sm:$0xff] (%p2003_p6), %v1421_v28  ;;  %v1433_v39 = vld [vmem:[%s2243_s12 + $0x180] sm:$0xff] (%p2003_p6)  ;;  %v1435_v26 = vld [vmem:[%s2243_s12 + $0x188] sm:$0xff] (%p2003_p6) }
 0x193   : > { %v1884_v62 = vpop.eup %1883  ;;  %1903 = vrcp.f32 %v1182_v53  ;;  %1424 = vst [vmem:[%s2491_s30 + $0x258] sm:$0xff] (%p2003_p6), %v1423_v14  ;;  %v1437_v53 = vld [vmem:[%s2243_s12 + $0x190] sm:$0xff] (%p2003_p6)  ;;  %1434 = vst [vmem:[%s2491_s30 + $0x300] sm:$0xff] (%p2003_p6), %v1433_v39 }
 0x194   : > { %v1886_v30 = vpop.eup %1885  ;;  %1277 = vst [vmem:[%s2243_s12 + $0xe0] sm:$0xff] %v1884_v62  ;;  %1905 = vrcp.f32 %v1184_v42  ;;  %1436 = vst [vmem:[%s2491_s30 + $0x308] sm:$0xff] (%p2003_p6), %v1435_v26  ;;  %v1439_v42 = vld [vmem:[%s2243_s12 + $0x198] sm:$0xff] (%p2003_p6)  ;;  %v1441_v62 = vld [vmem:[%s2243_s12 + $0x1a0] sm:$0xff] (%p2003_p6) }
 0x195   : > { %v1888_v52 = vpop.eup %1887  ;;  %1279 = vst [vmem:[%s2243_s12 + $0xf0] sm:$0xff] %v1886_v30  ;;  %1438 = vst [vmem:[%s2491_s30 + $0x310] sm:$0xff] (%p2003_p6), %v1437_v53  ;;  %v1443_v30 = vld [vmem:[%s2243_s12 + $0x1a8] sm:$0xff] (%p2003_p6) }
 0x196   : > { %v1890_v12 = vpop.eup %1889  ;;  %1278 = vst [vmem:[%s2243_s12 + $0xe8] sm:$0xff] %v1888_v52  ;;  %1440 = vst [vmem:[%s2491_s30 + $0x318] sm:$0xff] (%p2003_p6), %v1439_v42  ;;  %v1445_v52 = vld [vmem:[%s2243_s12 + $0x1b0] sm:$0xff] (%p2003_p6) }
 0x197   : > { %v1892_v33 = vpop.eup %1891  ;;  %1280 = vst [vmem:[%s2243_s12 + $0xf8] sm:$0xff] %v1890_v12  ;;  %1442 = vst [vmem:[%s2491_s30 + $0x320] sm:$0xff] (%p2003_p6), %v1441_v62  ;;  %v1447_v12 = vld [vmem:[%s2243_s12 + $0x1b8] sm:$0xff] (%p2003_p6) }
 0x198   : > { %v1894_v45 = vpop.eup %1893  ;;  %1293 = vst [vmem:[%s2243_s12 + $0x160] sm:$0xff] %v1892_v33  ;;  %1444 = vst [vmem:[%s2491_s30 + $0x328] sm:$0xff] (%p2003_p6), %v1443_v30  ;;  %v1449_v33 = vld [vmem:[%s2243_s12 + $0x1c0] sm:$0xff] (%p2003_p6) }
 0x199   : > { %v1896_v59 = vpop.eup %1895  ;;  %1295 = vst [vmem:[%s2243_s12 + $0x170] sm:$0xff] %v1894_v45  ;;  %1319 = sbr.rel (!%p2003_p6) target bundleno = 424 (0x1a8), region = 59  ;;  %1446 = vst [vmem:[%s2491_s30 + $0x330] sm:$0xff] (%p2003_p6), %v1445_v52  ;;  %v1451_v45 = vld [vmem:[%s2243_s12 + $0x1c8] sm:$0xff] (%p2003_p6) }
 0x19a   : > { %v1898_v32 = vpop.eup %1897  ;;  %1294 = vst [vmem:[%s2243_s12 + $0x168] sm:$0xff] %v1896_v59  ;;  %1448 = vst [vmem:[%s2491_s30 + $0x338] sm:$0xff] (%p2003_p6), %v1447_v12  ;;  %v1453_v59 = vld [vmem:[%s2243_s12 + $0x1d0] sm:$0xff] (%p2003_p6) }
 0x19b   : > { %v1900_v15 = vpop.eup %1899  ;;  %1296 = vst [vmem:[%s2243_s12 + $0x178] sm:$0xff] %v1898_v32  ;;  %v1393_v9 = vld [vmem:[%s2243_s12 + $0xe0] sm:$0xff] (%p2003_p6)  ;;  %1450 = vst [vmem:[%s2491_s30 + $0x340] sm:$0xff] (%p2003_p6), %v1449_v33  ;;  %v1455_v32 = vld [vmem:[%s2243_s12 + $0x1d8] sm:$0xff] (%p2003_p6) }
 0x19c   : > { %v1902_v29 = vpop.eup %1901  ;;  %1309 = vst [vmem:[%s2243_s12 + $0x1e0] sm:$0xff] %v1900_v15  ;;  %1394 = vst [vmem:[%s2491_s30 + $0x160] sm:$0xff] (%p2003_p6), %v1393_v9  ;;  %v1397_v18 = vld [vmem:[%s2243_s12 + $0xf0] sm:$0xff] (%p2003_p6) }
 0x19d   : > { %v1904_v46 = vpop.eup %1903  ;;  %1311 = vst [vmem:[%s2243_s12 + $0x1f0] sm:$0xff] %v1902_v29  ;;  %v1395_v4 = vld [vmem:[%s2243_s12 + $0xe8] sm:$0xff] (%p2003_p6)  ;;  %1398 = vst [vmem:[%s2491_s30 + $0x170] sm:$0xff] (%p2003_p6), %v1397_v18 }
 0x19e   : > { %v1906_v48 = vpop.eup %1905  ;;  %1310 = vst [vmem:[%s2243_s12 + $0x1e8] sm:$0xff] %v1904_v46  ;;  %1396 = vst [vmem:[%s2491_s30 + $0x168] sm:$0xff] (%p2003_p6), %v1395_v4  ;;  %v1399_v19 = vld [vmem:[%s2243_s12 + $0xf8] sm:$0xff] (%p2003_p6) }
 0x19f   : > { %1312 = vst [vmem:[%s2243_s12 + $0x1f8] sm:$0xff] %v1906_v48  ;;  %1400 = vst [vmem:[%s2491_s30 + $0x178] sm:$0xff] (%p2003_p6), %v1399_v19  ;;  %v1425_v38 = vld [vmem:[%s2243_s12 + $0x160] sm:$0xff] (%p2003_p6) }
 0x1a0   : > { %1426 = vst [vmem:[%s2491_s30 + $0x260] sm:$0xff] %v1425_v38  ;;  %v1429_v41 = vld [vmem:[%s2243_s12 + $0x170] sm:$0xff]  ;;  %1452 = vst [vmem:[%s2491_s30 + $0x348] sm:$0xff] %v1451_v45 }
 0x1a1   : > { %v1427_v7 = vld [vmem:[%s2243_s12 + $0x168] sm:$0xff]  ;;  %1430 = vst [vmem:[%s2491_s30 + $0x270] sm:$0xff] %v1429_v41  ;;  %1454 = vst [vmem:[%s2491_s30 + $0x350] sm:$0xff] %v1453_v59 }
 0x1a2   : > { %v1431_v17 = vld [vmem:[%s2243_s12 + $0x178] sm:$0xff]  ;;  %1428 = vst [vmem:[%s2491_s30 + $0x268] sm:$0xff] %v1427_v7  ;;  %1456 = vst [vmem:[%s2491_s30 + $0x358] sm:$0xff] %v1455_v32 }
 0x1a3   : > { %1432 = vst [vmem:[%s2491_s30 + $0x278] sm:$0xff] %v1431_v17  ;;  %v1457_v15 = vld [vmem:[%s2243_s12 + $0x1e0] sm:$0xff] }
 0x1a4   : > { %v1461_v46 = vld [vmem:[%s2243_s12 + $0x1f0] sm:$0xff]  ;;  %1458 = vst [vmem:[%s2491_s30 + $0x360] sm:$0xff] %v1457_v15 }
 0x1a5   : > { %v1459_v29 = vld [vmem:[%s2243_s12 + $0x1e8] sm:$0xff]  ;;  %1462 = vst [vmem:[%s2491_s30 + $0x370] sm:$0xff] %v1461_v46 }
 0x1a6   : > { %1460 = vst [vmem:[%s2491_s30 + $0x368] sm:$0xff] %v1459_v29  ;;  %v1463_v48 = vld [vmem:[%s2243_s12 + $0x1f8] sm:$0xff] }
 0x1a7   : > { %1464 = vst [vmem:[%s2491_s30 + $0x378] sm:$0xff] %v1463_v48 }
 0x1a8 PF: > { %s13_s16 = sadd.s32 1, %s1945_s16   ;;  %s2638_s12 = smov %s1933_s13 }
 0x1a9   : > { %p10_p11 = scmp.ge.s32.totalorder %s13_s16, 4   ;;  %s2639_s13 = smov %s2008_s22 }
 0x1aa   : > { %s2640_s14 = smov %s1941_s15  ;;  %s2641_s15 = smov %s2643_s17 }
 0x1ab   :  { %12 = sbr.rel (!%p10_p11) target bundleno = 3 (0x3), region = 113 }

</bundles_post_ra>
